<compile_context>
chip_gen: v5e
topology: v5e:2x2
jax: 0.10.0
libtpu: 0.0.40
codegen_flags: <defaults>
</compile_context>

<pallas_src>
import functools

import jax
import jax.numpy as jnp
from jax.experimental import pallas as pl
from jax.experimental.pallas import tpu as pltpu

# ------------------------- model config (small, runnable, lane-dense) -------------------------
DIM_MODEL = 128     # args.dim_model (multiple of 128 -> lane-dense stores)
DIM_FF = 512        # args.dim_ff
NUM_HEADS = 2
HEAD_DIM = DIM_MODEL // NUM_HEADS   # 64, matches bert-large head_dim
NUM_LAYERS = 4      # real config uses 24; reduced for a small runnable demo
VOCAB = 128
MAX_POS = 16
TYPE_VOCAB = 2
NUM_TYPES = 4       # num_types for the final classifier
LOGIT_PAD = 128     # classifier output padded to 128 lanes, sliced outside the kernel
LN_EPS = 1e-12


# ------------------------------ in-kernel helpers ----------------------------------


def _ln(x, g, b, eps):
    """LayerNorm along the last dim, fp32 math."""
    mu = jnp.mean(x, axis=-1, keepdims=True)
    var = jnp.mean(jnp.square(x - mu), axis=-1, keepdims=True)
    return (x - mu) * jax.lax.rsqrt(var + eps) * g + b


def _gelu(x):
    # TODO(synk): tanh-approx GELU; reference BERT uses erf GELU (~1e-3 activation delta).
    return 0.5 * x * (1.0 + jnp.tanh(0.7978845608028654 * (x + 0.044715 * x * x * x)))


# ------------------------------ fused encoder kernel --------------------------------


def _bert_encoder_kernel(emb_ref, eg_ref, eb_ref,
                         wqkv_ref, bqkv_ref, wo_ref, bo_ref, ln1g_ref, ln1b_ref,
                         w1_ref, b1_ref, w2_ref, b2_ref, ln2g_ref, ln2b_ref,
                         o_ref, h_sc,
                         *, scale, eps, num_heads, head_dim, bb, seq):
    """All encoder layers for one batch block.

    grid = (num_batch_blocks, num_layers); layer axis innermost ("arbitrary").
    emb_ref: [bb, S, D] fp32 embedding block (resident across the layer axis).
    weights: [1, ...] blocks taken from the stacked [L, ...] arrays at layer l.
    h_sc:    [bb*S, D] fp32 VMEM scratch carrying the hidden state across layers.
    """
    l = pl.program_id(1)
    n_layers = pl.num_programs(1)
    D = num_heads * head_dim
    N = bb * seq

    # ---- embedding LayerNorm, folded into the first layer step ----
    @pl.when(l == 0)
    def _():
        x = emb_ref[...].reshape(N, D).astype(jnp.float32)
        h_sc[...] = _ln(x, eg_ref[...], eb_ref[...], eps)

    h32 = h_sc[...]                              # [N, D] fp32 (residual source)
    hb = h32.astype(jnp.bfloat16)

    # ---- fused Q/K/V projection over the whole batch block (MXU row occupancy) ----
    qkv = (jnp.dot(hb, wqkv_ref[0], preferred_element_type=jnp.float32)
           + bqkv_ref[0]).astype(jnp.bfloat16)   # [N, 3D] bf16 right away

    # ---- attention: per-head, batched over the batch dim (no explicit transposes) ----
    # TODO(synk): padding attention_mask not applied (all-ones mask assumed).
    ctx_heads = []
    for hh in range(num_heads):
        lo = hh * head_dim
        q_h = qkv[:, lo:lo + head_dim].reshape(bb, seq, head_dim)
        k_h = qkv[:, D + lo:D + lo + head_dim].reshape(bb, seq, head_dim)
        v_h = qkv[:, 2 * D + lo:2 * D + lo + head_dim].reshape(bb, seq, head_dim)
        s = jnp.einsum('bqd,bkd->bqk', q_h, k_h,
                       preferred_element_type=jnp.float32) * scale
        s = s - jnp.max(s, axis=-1, keepdims=True)
        p = jnp.exp(s)
        p = p * pl.reciprocal(jnp.sum(p, axis=-1, keepdims=True), approx=True)
        ctx_h = jnp.einsum('bqk,bkd->bqd', p.astype(jnp.bfloat16), v_h,
                           preferred_element_type=jnp.float32)
        ctx_heads.append(ctx_h.reshape(N, head_dim).astype(jnp.bfloat16))
    ctx = jnp.concatenate(ctx_heads, axis=-1)    # [N, D] bf16

    # ---- output projection + residual + LayerNorm ----
    attn_out = jnp.dot(ctx, wo_ref[0], preferred_element_type=jnp.float32) + bo_ref[0]
    h1 = _ln(attn_out + h32, ln1g_ref[0], ln1b_ref[0], eps)

    # ---- feed-forward + GELU + residual + LayerNorm ----
    ff = jnp.dot(h1.astype(jnp.bfloat16), w1_ref[0],
                 preferred_element_type=jnp.float32) + b1_ref[0]
    ff = _gelu(ff)
    ff2 = jnp.dot(ff.astype(jnp.bfloat16), w2_ref[0],
                  preferred_element_type=jnp.float32) + b2_ref[0]
    h2 = _ln(ff2 + h1, ln2g_ref[0], ln2b_ref[0], eps)

    h_sc[...] = h2                               # carry to next layer (stays in VMEM)

    @pl.when(l == n_layers - 1)
    def _():
        o_ref[...] = h2.reshape(bb, seq, D).astype(o_ref.dtype)


def pallas_bert_encoder(emb, params, *, batch_block=None):
    """emb: [B, S, D] fp32 (pre-LN summed embeddings) -> [B, S, D] bf16 encoder output."""
    B, S, D = emb.shape
    L = params["wqkv"].shape[0]
    F = params["w1"].shape[2]
    bb = B if batch_block is None else batch_block
    assert B % bb == 0
    nb = B // bb
    scale = 1.0 / float(HEAD_DIM) ** 0.5

    def wspec(shape):
        # one layer slice of a stacked [L, ...] weight; prefetched along the layer axis
        return pl.BlockSpec((1,) + shape, lambda b, l: (l, 0, 0))

    h_in_spec = pl.BlockSpec((bb, S, D), lambda b, l: (b, 0, 0))
    h_out_spec = pl.BlockSpec((bb, S, D), lambda b, l: (b, 0, 0))

    kern = functools.partial(_bert_encoder_kernel, scale=scale, eps=LN_EPS,
                             num_heads=NUM_HEADS, head_dim=HEAD_DIM, bb=bb, seq=S)
    return pl.pallas_call(
        kern,
        out_shape=jax.ShapeDtypeStruct((B, S, D), jnp.bfloat16),
        grid=(nb, L),
        in_specs=[
            h_in_spec,
            pl.BlockSpec((1, D), lambda b, l: (0, 0)),   # emb LN gamma
            pl.BlockSpec((1, D), lambda b, l: (0, 0)),   # emb LN beta
            wspec((D, 3 * D)),                           # wqkv (bf16)
            wspec((1, 3 * D)),                           # bqkv (f32)
            wspec((D, D)),                               # wo
            wspec((1, D)),                               # bo
            wspec((1, D)), wspec((1, D)),                # ln1 g, b
            wspec((D, F)), wspec((1, F)),                # w1, b1
            wspec((F, D)), wspec((1, D)),                # w2, b2
            wspec((1, D)), wspec((1, D)),                # ln2 g, b
        ],
        out_specs=h_out_spec,
        scratch_shapes=[pltpu.VMEM((bb * S, D), jnp.float32)],
        compiler_params=pltpu.CompilerParams(
            dimension_semantics=("parallel", "arbitrary"),
            vmem_limit_bytes=32 * 1024 * 1024),
    )(emb, params["emb_ln_g"], params["emb_ln_b"],
      params["wqkv"], params["bqkv"], params["wo"], params["bo"],
      params["ln1_g"], params["ln1_b"],
      params["w1"], params["b1"], params["w2"], params["b2"],
      params["ln2_g"], params["ln2_b"])


# ------------------------------ pooler + classifier kernel -------------------------


def _pooler_cls_kernel(x_ref, pw_ref, pb_ref, cw_ref, cb_ref, pooled_ref, logits_ref):
    """pooled = tanh(x @ pool_w + pool_b); logits_pad = pooled @ cls_w_pad + cls_b_pad."""
    pooled = jnp.tanh(jnp.dot(x_ref[...], pw_ref[...],
                              preferred_element_type=jnp.float32) + pb_ref[...])
    pooled_ref[...] = pooled
    logits_ref[...] = (jnp.dot(pooled.astype(jnp.bfloat16), cw_ref[...],
                               preferred_element_type=jnp.float32) + cb_ref[...])


def pallas_pooler_classifier(cls_hidden, pool_w, pool_b, cls_w_pad, cls_b_pad):
    B, D = cls_hidden.shape
    T = cls_w_pad.shape[1]          # lane-padded classifier width (128)
    return pl.pallas_call(
        _pooler_cls_kernel,
        out_shape=(jax.ShapeDtypeStruct((B, D), jnp.float32),
                   jax.ShapeDtypeStruct((B, T), jnp.float32)),
        grid=(1,),
        in_specs=[
            pl.BlockSpec((B, D), lambda i: (0, 0)),
            pl.BlockSpec((D, D), lambda i: (0, 0)),
            pl.BlockSpec((1, D), lambda i: (0, 0)),
            pl.BlockSpec((D, T), lambda i: (0, 0)),
            pl.BlockSpec((1, T), lambda i: (0, 0)),
        ],
        out_specs=(pl.BlockSpec((B, D), lambda i: (0, 0)),
                   pl.BlockSpec((B, T), lambda i: (0, 0))),
    )(cls_hidden, pool_w, pool_b, cls_w_pad, cls_b_pad)


# ------------------------------ parameters ----------------------------------------


def init_params(key):
    def w(k, shape, std=0.02, dtype=jnp.bfloat16):
        return (std * jax.random.normal(k, shape, jnp.float32)).astype(dtype)

    L, D, F = NUM_LAYERS, DIM_MODEL, DIM_FF
    keys = iter(jax.random.split(key, 16))

    # classifier weight padded to 128 output lanes (columns NUM_TYPES..127 are zero)
    cls_w = w(next(keys), (D, NUM_TYPES), dtype=jnp.float32)
    cls_w_pad = jnp.zeros((D, LOGIT_PAD), jnp.float32).at[:, :NUM_TYPES].set(cls_w)

    return {
        "tok_emb": w(next(keys), (VOCAB, D), dtype=jnp.float32),
        "pos_emb": w(next(keys), (MAX_POS, D), dtype=jnp.float32),
        "typ_emb": w(next(keys), (TYPE_VOCAB, D), dtype=jnp.float32),
        "emb_ln_g": jnp.ones((1, D), jnp.float32),
        "emb_ln_b": jnp.zeros((1, D), jnp.float32),
        # stacked per-layer weights: layer axis first -> layer grid axis in the kernel
        "wqkv": w(next(keys), (L, D, 3 * D)),
        "bqkv": jnp.zeros((L, 1, 3 * D), jnp.float32),
        "wo": w(next(keys), (L, D, D)),
        "bo": jnp.zeros((L, 1, D), jnp.float32),
        "ln1_g": jnp.ones((L, 1, D), jnp.float32),
        "ln1_b": jnp.zeros((L, 1, D), jnp.float32),
        "w1": w(next(keys), (L, D, F)),
        "b1": jnp.zeros((L, 1, F), jnp.float32),
        "w2": w(next(keys), (L, F, D)),
        "b2": jnp.zeros((L, 1, D), jnp.float32),
        "ln2_g": jnp.ones((L, 1, D), jnp.float32),
        "ln2_b": jnp.zeros((L, 1, D), jnp.float32),
        # pooler + classifier
        "pool_w": w(next(keys), (D, D)),
        "pool_b": jnp.zeros((1, D), jnp.float32),
        "cls_w_pad": cls_w_pad.astype(jnp.bfloat16),
        "cls_b_pad": jnp.zeros((1, LOGIT_PAD), jnp.float32),
    }


# ------------------------------ forward pass ---------------------------------------


def bert_model_forward(params, input_ids, token_type_ids):
    """Mirrors BertModel.forward: bert(...).pooler_output (fp16) -> dense -> logits."""
    B, S = input_ids.shape
    assert S <= MAX_POS, "sequence length exceeds position-embedding table"

    # embeddings (gathers in plain JAX); LayerNorm is fused into the encoder kernel (l == 0)
    emb = (params["tok_emb"][input_ids]
           + params["pos_emb"][jnp.arange(S)][None, :, :]
           + params["typ_emb"][token_type_ids])                        # [B, S, D] fp32

    # single fused pallas_call: emb-LN + all encoder layers (layer axis on the grid)
    h = pallas_bert_encoder(emb, params)                               # [B, S, D] bf16

    # pooler (tanh dense) + classifier dense, fused into one kernel; lane-padded logits
    cls_hidden = h[:, 0, :]                                            # [B, D] bf16
    pooled_f32, logits_pad = pallas_pooler_classifier(
        cls_hidden, params["pool_w"], params["pool_b"],
        params["cls_w_pad"], params["cls_b_pad"])

    pooler_output = pooled_f32.astype(jnp.float16)
    assert pooler_output.dtype == jnp.float16                          # matches torch assert
    # TODO(synk): torch runs pooler/classifier in fp16; here fp32-accumulated then cast.
    logits = logits_pad[:, :NUM_TYPES].astype(jnp.float16)
    return logits


# ------------------------------------ main -----------------------------------------

if __name__ == "__main__":
    key = jax.random.PRNGKey(0)
    k_param, k_ids = jax.random.split(key)

    B, S = 2, 8
    params = init_params(k_param)
    input_ids = jax.random.randint(k_ids, (B, S), 0, VOCAB, dtype=jnp.int32)
    token_type_ids = jnp.zeros((B, S), dtype=jnp.int32)

    fwd = jax.jit(bert_model_forward)
    logits = fwd(params, input_ids, token_type_ids)
    jax.block_until_ready(logits)

    assert logits.shape == (B, NUM_TYPES)
    assert logits.dtype == jnp.float16
    print("KERNEL_OK")
</pallas_src>

<mosaic_0001>
module attributes {stable_mosaic.version = 11 : i64} {
  func.func @_pooler_cls_kernel(%arg0: i32, %arg1: memref<2x128xbf16, #tpu.memory_space<vmem>>, %arg2: memref<128x128xbf16, #tpu.memory_space<vmem>>, %arg3: memref<1x128xf32, #tpu.memory_space<vmem>>, %arg4: memref<128x128xbf16, #tpu.memory_space<vmem>>, %arg5: memref<1x128xf32, #tpu.memory_space<vmem>>, %arg6: memref<2x128xf32, #tpu.memory_space<vmem>>, %arg7: memref<2x128xf32, #tpu.memory_space<vmem>>) attributes {dimension_semantics = [#tpu.dimension_semantics<arbitrary>], iteration_bounds = array<i64: 1>, scalar_prefetch = 0 : i64, scratch_operands = 0 : i64, tpu.core_type = #tpu.core_type<tc>, window_params = [{pipeline_mode = #tpu.pipeline_mode<synchronous>, transform_indices = @transform_0, window_bounds = array<i64: 2, 128>}, {pipeline_mode = #tpu.pipeline_mode<synchronous>, transform_indices = @transform_1, window_bounds = array<i64: 128, 128>}, {pipeline_mode = #tpu.pipeline_mode<synchronous>, transform_indices = @transform_2, window_bounds = array<i64: 1, 128>}, {pipeline_mode = #tpu.pipeline_mode<synchronous>, transform_indices = @transform_3, window_bounds = array<i64: 128, 128>}, {pipeline_mode = #tpu.pipeline_mode<synchronous>, transform_indices = @transform_4, window_bounds = array<i64: 1, 128>}, {pipeline_mode = #tpu.pipeline_mode<synchronous>, transform_indices = @transform_5, window_bounds = array<i64: 2, 128>}, {pipeline_mode = #tpu.pipeline_mode<synchronous>, transform_indices = @transform_6, window_bounds = array<i64: 2, 128>}]} {
    %c0 = arith.constant 0 : index
    %c0_0 = arith.constant 0 : index
    %0 = vector.load %arg1[%c0, %c0_0] : memref<2x128xbf16, #tpu.memory_space<vmem>>, vector<2x128xbf16>
    %c0_1 = arith.constant 0 : index
    %c0_2 = arith.constant 0 : index
    %1 = vector.load %arg2[%c0_1, %c0_2] : memref<128x128xbf16, #tpu.memory_space<vmem>>, vector<128x128xbf16>
    %cst = arith.constant dense<0.000000e+00> : vector<2x128xf32>
    %2 = tpu.matmul %0, %1, %cst {dimension_numbers = #tpu.dot_dimension_numbers<[1], [0], [0], [1], [0, 0, 1, 1], [], []>} : vector<2x128xbf16>, vector<128x128xbf16>, vector<2x128xf32> -> vector<2x128xf32>
    %c0_3 = arith.constant 0 : index
    %c0_4 = arith.constant 0 : index
    %3 = vector.load %arg3[%c0_3, %c0_4] : memref<1x128xf32, #tpu.memory_space<vmem>>, vector<1x128xf32>
    %4 = vector.broadcast %3 : vector<1x128xf32> to vector<2x128xf32>
    %5 = arith.addf %2, %4 : vector<2x128xf32>
    %6 = math.tanh %5 : vector<2x128xf32>
    %c0_5 = arith.constant 0 : index
    %c0_6 = arith.constant 0 : index
    %7 = vector.load %arg6[%c0_5, %c0_6] : memref<2x128xf32, #tpu.memory_space<vmem>>, vector<2x128xf32>
    tpu.vector_store %arg6[%c0_5, %c0_6], %6 {strides = array<i32>} : memref<2x128xf32, #tpu.memory_space<vmem>>, vector<2x128xf32>,
    %8 = arith.truncf %6 : vector<2x128xf32> to vector<2x128xbf16>
    %c0_7 = arith.constant 0 : index
    %c0_8 = arith.constant 0 : index
    %9 = vector.load %arg4[%c0_7, %c0_8] : memref<128x128xbf16, #tpu.memory_space<vmem>>, vector<128x128xbf16>
    %cst_9 = arith.constant dense<0.000000e+00> : vector<2x128xf32>
    %10 = tpu.matmul %8, %9, %cst_9 {dimension_numbers = #tpu.dot_dimension_numbers<[1], [0], [0], [1], [0, 0, 1, 1], [], []>} : vector<2x128xbf16>, vector<128x128xbf16>, vector<2x128xf32> -> vector<2x128xf32>
    %c0_10 = arith.constant 0 : index
    %c0_11 = arith.constant 0 : index
    %11 = vector.load %arg5[%c0_10, %c0_11] : memref<1x128xf32, #tpu.memory_space<vmem>>, vector<1x128xf32>
    %12 = vector.broadcast %11 : vector<1x128xf32> to vector<2x128xf32>
    %13 = arith.addf %10, %12 : vector<2x128xf32>
    %c0_12 = arith.constant 0 : index
    %c0_13 = arith.constant 0 : index
    %14 = vector.load %arg7[%c0_12, %c0_13] : memref<2x128xf32, #tpu.memory_space<vmem>>, vector<2x128xf32>
    tpu.vector_store %arg7[%c0_12, %c0_13], %13 {strides = array<i32>} : memref<2x128xf32, #tpu.memory_space<vmem>>, vector<2x128xf32>,
    return
  }
  func.func @transform_0(%arg0: i32) -> (i32, i32) {
    %c0_i32 = arith.constant 0 : i32
    %c0_i32_0 = arith.constant 0 : i32
    %c0_i32_1 = arith.constant 0 : i32
    return %c0_i32, %c0_i32_0 : i32, i32
  }
  func.func @transform_1(%arg0: i32) -> (i32, i32) {
    %c0_i32 = arith.constant 0 : i32
    %c0_i32_0 = arith.constant 0 : i32
    %c0_i32_1 = arith.constant 0 : i32
    return %c0_i32, %c0_i32_0 : i32, i32
  }
  func.func @transform_2(%arg0: i32) -> (i32, i32) {
    %c0_i32 = arith.constant 0 : i32
    %c0_i32_0 = arith.constant 0 : i32
    %c0_i32_1 = arith.constant 0 : i32
    return %c0_i32, %c0_i32_0 : i32, i32
  }
  func.func @transform_3(%arg0: i32) -> (i32, i32) {
    %c0_i32 = arith.constant 0 : i32
    %c0_i32_0 = arith.constant 0 : i32
    %c0_i32_1 = arith.constant 0 : i32
    return %c0_i32, %c0_i32_0 : i32, i32
  }
  func.func @transform_4(%arg0: i32) -> (i32, i32) {
    %c0_i32 = arith.constant 0 : i32
    %c0_i32_0 = arith.constant 0 : i32
    %c0_i32_1 = arith.constant 0 : i32
    return %c0_i32, %c0_i32_0 : i32, i32
  }
  func.func @transform_5(%arg0: i32) -> (i32, i32) {
    %c0_i32 = arith.constant 0 : i32
    %c0_i32_0 = arith.constant 0 : i32
    %c0_i32_1 = arith.constant 0 : i32
    return %c0_i32, %c0_i32_0 : i32, i32
  }
  func.func @transform_6(%arg0: i32) -> (i32, i32) {
    %c0_i32 = arith.constant 0 : i32
    %c0_i32_0 = arith.constant 0 : i32
    %c0_i32_1 = arith.constant 0 : i32
    return %c0_i32, %c0_i32_0 : i32, i32
  }
}

module attributes {stable_mosaic.version = 11 : i64} {
  func.func @_bert_encoder_kernel(%arg0: i32, %arg1: i32, %arg2: memref<2x8x128xf32, #tpu.memory_space<vmem>>, %arg3: memref<1x128xf32, #tpu.memory_space<vmem>>, %arg4: memref<1x128xf32, #tpu.memory_space<vmem>>, %arg5: memref<1x128x384xbf16, #tpu.memory_space<vmem>>, %arg6: memref<1x1x384xf32, #tpu.memory_space<vmem>>, %arg7: memref<1x128x128xbf16, #tpu.memory_space<vmem>>, %arg8: memref<1x1x128xf32, #tpu.memory_space<vmem>>, %arg9: memref<1x1x128xf32, #tpu.memory_space<vmem>>, %arg10: memref<1x1x128xf32, #tpu.memory_space<vmem>>, %arg11: memref<1x128x512xbf16, #tpu.memory_space<vmem>>, %arg12: memref<1x1x512xf32, #tpu.memory_space<vmem>>, %arg13: memref<1x512x128xbf16, #tpu.memory_space<vmem>>, %arg14: memref<1x1x128xf32, #tpu.memory_space<vmem>>, %arg15: memref<1x1x128xf32, #tpu.memory_space<vmem>>, %arg16: memref<1x1x128xf32, #tpu.memory_space<vmem>>, %arg17: memref<2x8x128xbf16, #tpu.memory_space<vmem>>, %arg18: memref<16x128xf32, #tpu.memory_space<vmem>>) attributes {dimension_semantics = [#tpu.dimension_semantics<parallel>, #tpu.dimension_semantics<arbitrary>], iteration_bounds = array<i64: 1, 4>, scalar_prefetch = 0 : i64, scratch_operands = 1 : i64, tpu.core_type = #tpu.core_type<tc>, window_params = [{transform_indices = @transform_0, window_bounds = array<i64: 2, 8, 128>}, {pipeline_mode = #tpu.pipeline_mode<synchronous>, transform_indices = @transform_1, window_bounds = array<i64: 1, 128>}, {pipeline_mode = #tpu.pipeline_mode<synchronous>, transform_indices = @transform_2, window_bounds = array<i64: 1, 128>}, {transform_indices = @transform_3, window_bounds = array<i64: 1, 128, 384>}, {transform_indices = @transform_4, window_bounds = array<i64: 1, 1, 384>}, {transform_indices = @transform_5, window_bounds = array<i64: 1, 128, 128>}, {transform_indices = @transform_6, window_bounds = array<i64: 1, 1, 128>}, {transform_indices = @transform_7, window_bounds = array<i64: 1, 1, 128>}, {transform_indices = @transform_8, window_bounds = array<i64: 1, 1, 128>}, {transform_indices = @transform_9, window_bounds = array<i64: 1, 128, 512>}, {transform_indices = @transform_10, window_bounds = array<i64: 1, 1, 512>}, {transform_indices = @transform_11, window_bounds = array<i64: 1, 512, 128>}, {transform_indices = @transform_12, window_bounds = array<i64: 1, 1, 128>}, {transform_indices = @transform_13, window_bounds = array<i64: 1, 1, 128>}, {transform_indices = @transform_14, window_bounds = array<i64: 1, 1, 128>}, {transform_indices = @transform_15, window_bounds = array<i64: 2, 8, 128>}]} {
    %c0_i32 = arith.constant 0 : i32
    %0 = arith.cmpi eq, %arg1, %c0_i32 : i32
    %1 = arith.extui %0 : i1 to i32
    %c0_i32_0 = arith.constant 0 : i32
    %2 = arith.cmpi ne, %1, %c0_i32_0 : i32
    scf.if %2 {
      %c0_68 = arith.constant 0 : index
      %c0_69 = arith.constant 0 : index
      %c0_70 = arith.constant 0 : index
      %154 = vector.load %arg2[%c0_68, %c0_69, %c0_70] : memref<2x8x128xf32, #tpu.memory_space<vmem>>, vector<2x8x128xf32>
      %155 = vector.shape_cast %154 : vector<2x8x128xf32> to vector<16x128xf32>
      %c0_71 = arith.constant 0 : index
      %c0_72 = arith.constant 0 : index
      %156 = vector.load %arg3[%c0_71, %c0_72] : memref<1x128xf32, #tpu.memory_space<vmem>>, vector<1x128xf32>
      %c0_73 = arith.constant 0 : index
      %c0_74 = arith.constant 0 : index
      %157 = vector.load %arg4[%c0_73, %c0_74] : memref<1x128xf32, #tpu.memory_space<vmem>>, vector<1x128xf32>
      %cst_75 = arith.constant dense<0.000000e+00> : vector<16xf32>
      %158 = vector.multi_reduction <add>, %155, %cst_75 [1] : vector<16x128xf32> to vector<16xf32>
      %159 = vector.shape_cast %158 : vector<16xf32> to vector<16x1xf32>
      %cst_76 = arith.constant 1.280000e+02 : f32
      %160 = vector.broadcast %cst_76 : f32 to vector<16x1xf32>
      %161 = arith.divf %159, %160 : vector<16x1xf32>
      %162 = vector.broadcast %161 : vector<16x1xf32> to vector<16x128xf32>
      %163 = arith.subf %155, %162 : vector<16x128xf32>
      %164 = arith.mulf %163, %163 : vector<16x128xf32>
      %cst_77 = arith.constant dense<0.000000e+00> : vector<16xf32>
      %165 = vector.multi_reduction <add>, %164, %cst_77 [1] : vector<16x128xf32> to vector<16xf32>
      %166 = vector.shape_cast %165 : vector<16xf32> to vector<16x1xf32>
      %cst_78 = arith.constant 1.280000e+02 : f32
      %167 = vector.broadcast %cst_78 : f32 to vector<16x1xf32>
      %168 = arith.divf %166, %167 : vector<16x1xf32>
      %169 = vector.broadcast %161 : vector<16x1xf32> to vector<16x128xf32>
      %170 = arith.subf %155, %169 : vector<16x128xf32>
      %cst_79 = arith.constant 9.99999996E-13 : f32
      %171 = vector.broadcast %cst_79 : f32 to vector<16x1xf32>
      %172 = arith.addf %168, %171 : vector<16x1xf32>
      %173 = math.rsqrt %172 : vector<16x1xf32>
      %174 = vector.broadcast %173 : vector<16x1xf32> to vector<16x128xf32>
      %175 = arith.mulf %170, %174 : vector<16x128xf32>
      %176 = vector.broadcast %156 : vector<1x128xf32> to vector<16x128xf32>
      %177 = arith.mulf %175, %176 : vector<16x128xf32>
      %178 = vector.broadcast %157 : vector<1x128xf32> to vector<16x128xf32>
      %179 = arith.addf %177, %178 : vector<16x128xf32>
      %c0_80 = arith.constant 0 : index
      %c0_81 = arith.constant 0 : index
      %180 = vector.load %arg18[%c0_80, %c0_81] : memref<16x128xf32, #tpu.memory_space<vmem>>, vector<16x128xf32>
      tpu.vector_store %arg18[%c0_80, %c0_81], %179 {strides = array<i32>} : memref<16x128xf32, #tpu.memory_space<vmem>>, vector<16x128xf32>,
    } else {
    }
    %c0 = arith.constant 0 : index
    %c0_1 = arith.constant 0 : index
    %3 = vector.load %arg18[%c0, %c0_1] : memref<16x128xf32, #tpu.memory_space<vmem>>, vector<16x128xf32>
    %4 = arith.truncf %3 : vector<16x128xf32> to vector<16x128xbf16>
    %c0_2 = arith.constant 0 : index
    %c0_3 = arith.constant 0 : index
    %c0_4 = arith.constant 0 : index
    %5 = vector.load %arg5[%c0_2, %c0_3, %c0_4] : memref<1x128x384xbf16, #tpu.memory_space<vmem>>, vector<1x128x384xbf16>
    %6 = vector.shape_cast %5 : vector<1x128x384xbf16> to vector<128x384xbf16>
    %cst = arith.constant dense<0.000000e+00> : vector<16x384xf32>
    %7 = tpu.matmul %4, %6, %cst {dimension_numbers = #tpu.dot_dimension_numbers<[1], [0], [0], [1], [0, 0, 1, 1], [], []>} : vector<16x128xbf16>, vector<128x384xbf16>, vector<16x384xf32> -> vector<16x384xf32>
    %c0_5 = arith.constant 0 : index
    %c0_6 = arith.constant 0 : index
    %c0_7 = arith.constant 0 : index
    %8 = vector.load %arg6[%c0_5, %c0_6, %c0_7] : memref<1x1x384xf32, #tpu.memory_space<vmem>>, vector<1x1x384xf32>
    %9 = vector.shape_cast %8 : vector<1x1x384xf32> to vector<1x384xf32>
    %10 = vector.broadcast %9 : vector<1x384xf32> to vector<16x384xf32>
    %11 = arith.addf %7, %10 : vector<16x384xf32>
    %12 = arith.truncf %11 : vector<16x384xf32> to vector<16x384xbf16>
    %13 = vector.extract_strided_slice %12 {offsets = [0, 0], sizes = [16, 64], strides = [1, 1]} : vector<16x384xbf16> to vector<16x64xbf16>
    %14 = vector.shape_cast %13 : vector<16x64xbf16> to vector<2x8x64xbf16>
    %15 = vector.extract_strided_slice %12 {offsets = [0, 128], sizes = [16, 64], strides = [1, 1]} : vector<16x384xbf16> to vector<16x64xbf16>
    %16 = vector.shape_cast %15 : vector<16x64xbf16> to vector<2x8x64xbf16>
    %17 = vector.extract_strided_slice %12 {offsets = [0, 256], sizes = [16, 64], strides = [1, 1]} : vector<16x384xbf16> to vector<16x64xbf16>
    %18 = vector.shape_cast %17 : vector<16x64xbf16> to vector<2x8x64xbf16>
    "tpu.trace_start"() <{level = 10 : i32, message = "bqd,bkd->bqk"}> : () -> ()
    %cst_8 = arith.constant dense<0.000000e+00> : vector<2x8x8xf32>
    %19 = tpu.matmul %14, %16, %cst_8 {dimension_numbers = #tpu.dot_dimension_numbers<[2], [2], [1], [1], [0, 0, 0, 1, 1, 1], [0], [0]>} : vector<2x8x64xbf16>, vector<2x8x64xbf16>, vector<2x8x8xf32> -> vector<2x8x8xf32>
    "tpu.trace_stop"() : () -> ()
    %cst_9 = arith.constant 1.250000e-01 : f32
    %20 = vector.broadcast %cst_9 : f32 to vector<2x8x8xf32>
    %21 = arith.mulf %19, %20 : vector<2x8x8xf32>
    %cst_10 = arith.constant dense<0xFF800000> : vector<2x8xf32>
    %22 = vector.multi_reduction <maximumf>, %21, %cst_10 [2] : vector<2x8x8xf32> to vector<2x8xf32>
    %23 = vector.shape_cast %22 : vector<2x8xf32> to vector<2x8x1xf32>
    %24 = vector.broadcast %23 : vector<2x8x1xf32> to vector<2x8x8xf32>
    %25 = arith.subf %21, %24 : vector<2x8x8xf32>
    %26 = math.exp %25 : vector<2x8x8xf32>
    %cst_11 = arith.constant dense<0.000000e+00> : vector<2x8xf32>
    %27 = vector.multi_reduction <add>, %26, %cst_11 [2] : vector<2x8x8xf32> to vector<2x8xf32>
    %28 = vector.shape_cast %27 : vector<2x8xf32> to vector<2x8x1xf32>
    %29 = tpu.reciprocal %28 {approx = true} : vector<2x8x1xf32> -> vector<2x8x1xf32>
    %30 = vector.broadcast %29 : vector<2x8x1xf32> to vector<2x8x8xf32>
    %31 = arith.mulf %26, %30 : vector<2x8x8xf32>
    %32 = arith.truncf %31 : vector<2x8x8xf32> to vector<2x8x8xbf16>
    "tpu.trace_start"() <{level = 10 : i32, message = "bqk,bkd->bqd"}> : () -> ()
    %cst_12 = arith.constant dense<0.000000e+00> : vector<2x8x64xf32>
    %33 = tpu.matmul %32, %18, %cst_12 {dimension_numbers = #tpu.dot_dimension_numbers<[2], [1], [1], [2], [0, 0, 0, 1, 1, 2], [0], [0]>} : vector<2x8x8xbf16>, vector<2x8x64xbf16>, vector<2x8x64xf32> -> vector<2x8x64xf32>
    "tpu.trace_stop"() : () -> ()
    %34 = vector.shape_cast %33 : vector<2x8x64xf32> to vector<16x64xf32>
    %35 = arith.truncf %34 : vector<16x64xf32> to vector<16x64xbf16>
    %36 = vector.extract_strided_slice %12 {offsets = [0, 64], sizes = [16, 64], strides = [1, 1]} : vector<16x384xbf16> to vector<16x64xbf16>
    %37 = vector.shape_cast %36 : vector<16x64xbf16> to vector<2x8x64xbf16>
    %38 = vector.extract_strided_slice %12 {offsets = [0, 192], sizes = [16, 64], strides = [1, 1]} : vector<16x384xbf16> to vector<16x64xbf16>
    %39 = vector.shape_cast %38 : vector<16x64xbf16> to vector<2x8x64xbf16>
    %40 = vector.extract_strided_slice %12 {offsets = [0, 320], sizes = [16, 64], strides = [1, 1]} : vector<16x384xbf16> to vector<16x64xbf16>
    %41 = vector.shape_cast %40 : vector<16x64xbf16> to vector<2x8x64xbf16>
    "tpu.trace_start"() <{level = 10 : i32, message = "bqd,bkd->bqk"}> : () -> ()
    %cst_13 = arith.constant dense<0.000000e+00> : vector<2x8x8xf32>
    %42 = tpu.matmul %37, %39, %cst_13 {dimension_numbers = #tpu.dot_dimension_numbers<[2], [2], [1], [1], [0, 0, 0, 1, 1, 1], [0], [0]>} : vector<2x8x64xbf16>, vector<2x8x64xbf16>, vector<2x8x8xf32> -> vector<2x8x8xf32>
    "tpu.trace_stop"() : () -> ()
    %cst_14 = arith.constant 1.250000e-01 : f32
    %43 = vector.broadcast %cst_14 : f32 to vector<2x8x8xf32>
    %44 = arith.mulf %42, %43 : vector<2x8x8xf32>
    %cst_15 = arith.constant dense<0xFF800000> : vector<2x8xf32>
    %45 = vector.multi_reduction <maximumf>, %44, %cst_15 [2] : vector<2x8x8xf32> to vector<2x8xf32>
    %46 = vector.shape_cast %45 : vector<2x8xf32> to vector<2x8x1xf32>
    %47 = vector.broadcast %46 : vector<2x8x1xf32> to vector<2x8x8xf32>
    %48 = arith.subf %44, %47 : vector<2x8x8xf32>
    %49 = math.exp %48 : vector<2x8x8xf32>
    %cst_16 = arith.constant dense<0.000000e+00> : vector<2x8xf32>
    %50 = vector.multi_reduction <add>, %49, %cst_16 [2] : vector<2x8x8xf32> to vector<2x8xf32>
    %51 = vector.shape_cast %50 : vector<2x8xf32> to vector<2x8x1xf32>
    %52 = tpu.reciprocal %51 {approx = true} : vector<2x8x1xf32> -> vector<2x8x1xf32>
    %53 = vector.broadcast %52 : vector<2x8x1xf32> to vector<2x8x8xf32>
    %54 = arith.mulf %49, %53 : vector<2x8x8xf32>
    %55 = arith.truncf %54 : vector<2x8x8xf32> to vector<2x8x8xbf16>
    "tpu.trace_start"() <{level = 10 : i32, message = "bqk,bkd->bqd"}> : () -> ()
    %cst_17 = arith.constant dense<0.000000e+00> : vector<2x8x64xf32>
    %56 = tpu.matmul %55, %41, %cst_17 {dimension_numbers = #tpu.dot_dimension_numbers<[2], [1], [1], [2], [0, 0, 0, 1, 1, 2], [0], [0]>} : vector<2x8x8xbf16>, vector<2x8x64xbf16>, vector<2x8x64xf32> -> vector<2x8x64xf32>
    "tpu.trace_stop"() : () -> ()
    %57 = vector.shape_cast %56 : vector<2x8x64xf32> to vector<16x64xf32>
    %58 = arith.truncf %57 : vector<16x64xf32> to vector<16x64xbf16>
    %59 = tpu.concatenate %35, %58 in 1 : vector<16x64xbf16>, vector<16x64xbf16> -> vector<16x128xbf16>
    %c0_18 = arith.constant 0 : index
    %c0_19 = arith.constant 0 : index
    %c0_20 = arith.constant 0 : index
    %60 = vector.load %arg7[%c0_18, %c0_19, %c0_20] : memref<1x128x128xbf16, #tpu.memory_space<vmem>>, vector<1x128x128xbf16>
    %61 = vector.shape_cast %60 : vector<1x128x128xbf16> to vector<128x128xbf16>
    %cst_21 = arith.constant dense<0.000000e+00> : vector<16x128xf32>
    %62 = tpu.matmul %59, %61, %cst_21 {dimension_numbers = #tpu.dot_dimension_numbers<[1], [0], [0], [1], [0, 0, 1, 1], [], []>} : vector<16x128xbf16>, vector<128x128xbf16>, vector<16x128xf32> -> vector<16x128xf32>
    %c0_22 = arith.constant 0 : index
    %c0_23 = arith.constant 0 : index
    %c0_24 = arith.constant 0 : index
    %63 = vector.load %arg8[%c0_22, %c0_23, %c0_24] : memref<1x1x128xf32, #tpu.memory_space<vmem>>, vector<1x1x128xf32>
    %64 = vector.shape_cast %63 : vector<1x1x128xf32> to vector<1x128xf32>
    %65 = vector.broadcast %64 : vector<1x128xf32> to vector<16x128xf32>
    %66 = arith.addf %62, %65 : vector<16x128xf32>
    %67 = arith.addf %66, %3 : vector<16x128xf32>
    %c0_25 = arith.constant 0 : index
    %c0_26 = arith.constant 0 : index
    %c0_27 = arith.constant 0 : index
    %68 = vector.load %arg9[%c0_25, %c0_26, %c0_27] : memref<1x1x128xf32, #tpu.memory_space<vmem>>, vector<1x1x128xf32>
    %69 = vector.shape_cast %68 : vector<1x1x128xf32> to vector<1x128xf32>
    %c0_28 = arith.constant 0 : index
    %c0_29 = arith.constant 0 : index
    %c0_30 = arith.constant 0 : index
    %70 = vector.load %arg10[%c0_28, %c0_29, %c0_30] : memref<1x1x128xf32, #tpu.memory_space<vmem>>, vector<1x1x128xf32>
    %71 = vector.shape_cast %70 : vector<1x1x128xf32> to vector<1x128xf32>
    %cst_31 = arith.constant dense<0.000000e+00> : vector<16xf32>
    %72 = vector.multi_reduction <add>, %67, %cst_31 [1] : vector<16x128xf32> to vector<16xf32>
    %73 = vector.shape_cast %72 : vector<16xf32> to vector<16x1xf32>
    %cst_32 = arith.constant 1.280000e+02 : f32
    %74 = vector.broadcast %cst_32 : f32 to vector<16x1xf32>
    %75 = arith.divf %73, %74 : vector<16x1xf32>
    %76 = vector.broadcast %75 : vector<16x1xf32> to vector<16x128xf32>
    %77 = arith.subf %67, %76 : vector<16x128xf32>
    %78 = arith.mulf %77, %77 : vector<16x128xf32>
    %cst_33 = arith.constant dense<0.000000e+00> : vector<16xf32>
    %79 = vector.multi_reduction <add>, %78, %cst_33 [1] : vector<16x128xf32> to vector<16xf32>
    %80 = vector.shape_cast %79 : vector<16xf32> to vector<16x1xf32>
    %cst_34 = arith.constant 1.280000e+02 : f32
    %81 = vector.broadcast %cst_34 : f32 to vector<16x1xf32>
    %82 = arith.divf %80, %81 : vector<16x1xf32>
    %83 = vector.broadcast %75 : vector<16x1xf32> to vector<16x128xf32>
    %84 = arith.subf %67, %83 : vector<16x128xf32>
    %cst_35 = arith.constant 9.99999996E-13 : f32
    %85 = vector.broadcast %cst_35 : f32 to vector<16x1xf32>
    %86 = arith.addf %82, %85 : vector<16x1xf32>
    %87 = math.rsqrt %86 : vector<16x1xf32>
    %88 = vector.broadcast %87 : vector<16x1xf32> to vector<16x128xf32>
    %89 = arith.mulf %84, %88 : vector<16x128xf32>
    %90 = vector.broadcast %69 : vector<1x128xf32> to vector<16x128xf32>
    %91 = arith.mulf %89, %90 : vector<16x128xf32>
    %92 = vector.broadcast %71 : vector<1x128xf32> to vector<16x128xf32>
    %93 = arith.addf %91, %92 : vector<16x128xf32>
    %94 = arith.truncf %93 : vector<16x128xf32> to vector<16x128xbf16>
    %c0_36 = arith.constant 0 : index
    %c0_37 = arith.constant 0 : index
    %c0_38 = arith.constant 0 : index
    %95 = vector.load %arg11[%c0_36, %c0_37, %c0_38] : memref<1x128x512xbf16, #tpu.memory_space<vmem>>, vector<1x128x512xbf16>
    %96 = vector.shape_cast %95 : vector<1x128x512xbf16> to vector<128x512xbf16>
    %cst_39 = arith.constant dense<0.000000e+00> : vector<16x512xf32>
    %97 = tpu.matmul %94, %96, %cst_39 {dimension_numbers = #tpu.dot_dimension_numbers<[1], [0], [0], [1], [0, 0, 1, 1], [], []>} : vector<16x128xbf16>, vector<128x512xbf16>, vector<16x512xf32> -> vector<16x512xf32>
    %c0_40 = arith.constant 0 : index
    %c0_41 = arith.constant 0 : index
    %c0_42 = arith.constant 0 : index
    %98 = vector.load %arg12[%c0_40, %c0_41, %c0_42] : memref<1x1x512xf32, #tpu.memory_space<vmem>>, vector<1x1x512xf32>
    %99 = vector.shape_cast %98 : vector<1x1x512xf32> to vector<1x512xf32>
    %100 = vector.broadcast %99 : vector<1x512xf32> to vector<16x512xf32>
    %101 = arith.addf %97, %100 : vector<16x512xf32>
    %cst_43 = arith.constant 5.000000e-01 : f32
    %102 = vector.broadcast %cst_43 : f32 to vector<16x512xf32>
    %103 = arith.mulf %102, %101 : vector<16x512xf32>
    %cst_44 = arith.constant 4.471500e-02 : f32
    %104 = vector.broadcast %cst_44 : f32 to vector<16x512xf32>
    %105 = arith.mulf %104, %101 : vector<16x512xf32>
    %106 = arith.mulf %105, %101 : vector<16x512xf32>
    %107 = arith.mulf %106, %101 : vector<16x512xf32>
    %108 = arith.addf %101, %107 : vector<16x512xf32>
    %cst_45 = arith.constant 0.797884583 : f32
    %109 = vector.broadcast %cst_45 : f32 to vector<16x512xf32>
    %110 = arith.mulf %109, %108 : vector<16x512xf32>
    %111 = math.tanh %110 : vector<16x512xf32>
    %cst_46 = arith.constant 1.000000e+00 : f32
    %112 = vector.broadcast %cst_46 : f32 to vector<16x512xf32>
    %113 = arith.addf %112, %111 : vector<16x512xf32>
    %114 = arith.mulf %103, %113 : vector<16x512xf32>
    %115 = arith.truncf %114 : vector<16x512xf32> to vector<16x512xbf16>
    %c0_47 = arith.constant 0 : index
    %c0_48 = arith.constant 0 : index
    %c0_49 = arith.constant 0 : index
    %116 = vector.load %arg13[%c0_47, %c0_48, %c0_49] : memref<1x512x128xbf16, #tpu.memory_space<vmem>>, vector<1x512x128xbf16>
    %117 = vector.shape_cast %116 : vector<1x512x128xbf16> to vector<512x128xbf16>
    %cst_50 = arith.constant dense<0.000000e+00> : vector<16x128xf32>
    %118 = tpu.matmul %115, %117, %cst_50 {dimension_numbers = #tpu.dot_dimension_numbers<[1], [0], [0], [1], [0, 0, 1, 1], [], []>} : vector<16x512xbf16>, vector<512x128xbf16>, vector<16x128xf32> -> vector<16x128xf32>
    %c0_51 = arith.constant 0 : index
    %c0_52 = arith.constant 0 : index
    %c0_53 = arith.constant 0 : index
    %119 = vector.load %arg14[%c0_51, %c0_52, %c0_53] : memref<1x1x128xf32, #tpu.memory_space<vmem>>, vector<1x1x128xf32>
    %120 = vector.shape_cast %119 : vector<1x1x128xf32> to vector<1x128xf32>
    %121 = vector.broadcast %120 : vector<1x128xf32> to vector<16x128xf32>
    %122 = arith.addf %118, %121 : vector<16x128xf32>
    %123 = arith.addf %122, %93 : vector<16x128xf32>
    %c0_54 = arith.constant 0 : index
    %c0_55 = arith.constant 0 : index
    %c0_56 = arith.constant 0 : index
    %124 = vector.load %arg15[%c0_54, %c0_55, %c0_56] : memref<1x1x128xf32, #tpu.memory_space<vmem>>, vector<1x1x128xf32>
    %125 = vector.shape_cast %124 : vector<1x1x128xf32> to vector<1x128xf32>
    %c0_57 = arith.constant 0 : index
    %c0_58 = arith.constant 0 : index
    %c0_59 = arith.constant 0 : index
    %126 = vector.load %arg16[%c0_57, %c0_58, %c0_59] : memref<1x1x128xf32, #tpu.memory_space<vmem>>, vector<1x1x128xf32>
    %127 = vector.shape_cast %126 : vector<1x1x128xf32> to vector<1x128xf32>
    %cst_60 = arith.constant dense<0.000000e+00> : vector<16xf32>
    %128 = vector.multi_reduction <add>, %123, %cst_60 [1] : vector<16x128xf32> to vector<16xf32>
    %129 = vector.shape_cast %128 : vector<16xf32> to vector<16x1xf32>
    %cst_61 = arith.constant 1.280000e+02 : f32
    %130 = vector.broadcast %cst_61 : f32 to vector<16x1xf32>
    %131 = arith.divf %129, %130 : vector<16x1xf32>
    %132 = vector.broadcast %131 : vector<16x1xf32> to vector<16x128xf32>
    %133 = arith.subf %123, %132 : vector<16x128xf32>
    %134 = arith.mulf %133, %133 : vector<16x128xf32>
    %cst_62 = arith.constant dense<0.000000e+00> : vector<16xf32>
    %135 = vector.multi_reduction <add>, %134, %cst_62 [1] : vector<16x128xf32> to vector<16xf32>
    %136 = vector.shape_cast %135 : vector<16xf32> to vector<16x1xf32>
    %cst_63 = arith.constant 1.280000e+02 : f32
    %137 = vector.broadcast %cst_63 : f32 to vector<16x1xf32>
    %138 = arith.divf %136, %137 : vector<16x1xf32>
    %139 = vector.broadcast %131 : vector<16x1xf32> to vector<16x128xf32>
    %140 = arith.subf %123, %139 : vector<16x128xf32>
    %cst_64 = arith.constant 9.99999996E-13 : f32
    %141 = vector.broadcast %cst_64 : f32 to vector<16x1xf32>
    %142 = arith.addf %138, %141 : vector<16x1xf32>
    %143 = math.rsqrt %142 : vector<16x1xf32>
    %144 = vector.broadcast %143 : vector<16x1xf32> to vector<16x128xf32>
    %145 = arith.mulf %140, %144 : vector<16x128xf32>
    %146 = vector.broadcast %125 : vector<1x128xf32> to vector<16x128xf32>
    %147 = arith.mulf %145, %146 : vector<16x128xf32>
    %148 = vector.broadcast %127 : vector<1x128xf32> to vector<16x128xf32>
    %149 = arith.addf %147, %148 : vector<16x128xf32>
    %c0_65 = arith.constant 0 : index
    %c0_66 = arith.constant 0 : index
    %150 = vector.load %arg18[%c0_65, %c0_66] : memref<16x128xf32, #tpu.memory_space<vmem>>, vector<16x128xf32>
    tpu.vector_store %arg18[%c0_65, %c0_66], %149 {strides = array<i32>} : memref<16x128xf32, #tpu.memory_space<vmem>>, vector<16x128xf32>,
    %c3_i32 = arith.constant 3 : i32
    %151 = arith.cmpi eq, %arg1, %c3_i32 : i32
    %152 = arith.extui %151 : i1 to i32
    %c0_i32_67 = arith.constant 0 : i32
    %153 = arith.cmpi ne, %152, %c0_i32_67 : i32
    scf.if %153 {
      %154 = vector.shape_cast %149 : vector<16x128xf32> to vector<2x8x128xf32>
      %155 = arith.truncf %154 : vector<2x8x128xf32> to vector<2x8x128xbf16>
      %c0_68 = arith.constant 0 : index
      %c0_69 = arith.constant 0 : index
      %c0_70 = arith.constant 0 : index
      %156 = vector.load %arg17[%c0_68, %c0_69, %c0_70] : memref<2x8x128xbf16, #tpu.memory_space<vmem>>, vector<2x8x128xbf16>
      tpu.vector_store %arg17[%c0_68, %c0_69, %c0_70], %155 {strides = array<i32>} : memref<2x8x128xbf16, #tpu.memory_space<vmem>>, vector<2x8x128xbf16>,
    } else {
    }
    return
  }
  func.func @transform_0(%arg0: i32, %arg1: i32) -> (i32, i32, i32) {
    %c0_i32 = arith.constant 0 : i32
    %c0_i32_0 = arith.constant 0 : i32
    %c0_i32_1 = arith.constant 0 : i32
    return %arg0, %c0_i32, %c0_i32_0 : i32, i32, i32
  }
  func.func @transform_1(%arg0: i32, %arg1: i32) -> (i32, i32) {
    %c0_i32 = arith.constant 0 : i32
    %c0_i32_0 = arith.constant 0 : i32
    %c0_i32_1 = arith.constant 0 : i32
    return %c0_i32, %c0_i32_0 : i32, i32
  }
  func.func @transform_2(%arg0: i32, %arg1: i32) -> (i32, i32) {
    %c0_i32 = arith.constant 0 : i32
    %c0_i32_0 = arith.constant 0 : i32
    %c0_i32_1 = arith.constant 0 : i32
    return %c0_i32, %c0_i32_0 : i32, i32
  }
  func.func @transform_3(%arg0: i32, %arg1: i32) -> (i32, i32, i32) {
    %c0_i32 = arith.constant 0 : i32
    %c0_i32_0 = arith.constant 0 : i32
    %c0_i32_1 = arith.constant 0 : i32
    return %arg1, %c0_i32, %c0_i32_0 : i32, i32, i32
  }
  func.func @transform_4(%arg0: i32, %arg1: i32) -> (i32, i32, i32) {
    %c0_i32 = arith.constant 0 : i32
    %c0_i32_0 = arith.constant 0 : i32
    %c0_i32_1 = arith.constant 0 : i32
    return %arg1, %c0_i32, %c0_i32_0 : i32, i32, i32
  }
  func.func @transform_5(%arg0: i32, %arg1: i32) -> (i32, i32, i32) {
    %c0_i32 = arith.constant 0 : i32
    %c0_i32_0 = arith.constant 0 : i32
    %c0_i32_1 = arith.constant 0 : i32
    return %arg1, %c0_i32, %c0_i32_0 : i32, i32, i32
  }
  func.func @transform_6(%arg0: i32, %arg1: i32) -> (i32, i32, i32) {
    %c0_i32 = arith.constant 0 : i32
    %c0_i32_0 = arith.constant 0 : i32
    %c0_i32_1 = arith.constant 0 : i32
    return %arg1, %c0_i32, %c0_i32_0 : i32, i32, i32
  }
  func.func @transform_7(%arg0: i32, %arg1: i32) -> (i32, i32, i32) {
    %c0_i32 = arith.constant 0 : i32
    %c0_i32_0 = arith.constant 0 : i32
    %c0_i32_1 = arith.constant 0 : i32
    return %arg1, %c0_i32, %c0_i32_0 : i32, i32, i32
  }
  func.func @transform_8(%arg0: i32, %arg1: i32) -> (i32, i32, i32) {
    %c0_i32 = arith.constant 0 : i32
    %c0_i32_0 = arith.constant 0 : i32
    %c0_i32_1 = arith.constant 0 : i32
    return %arg1, %c0_i32, %c0_i32_0 : i32, i32, i32
  }
  func.func @transform_9(%arg0: i32, %arg1: i32) -> (i32, i32, i32) {
    %c0_i32 = arith.constant 0 : i32
    %c0_i32_0 = arith.constant 0 : i32
    %c0_i32_1 = arith.constant 0 : i32
    return %arg1, %c0_i32, %c0_i32_0 : i32, i32, i32
  }
  func.func @transform_10(%arg0: i32, %arg1: i32) -> (i32, i32, i32) {
    %c0_i32 = arith.constant 0 : i32
    %c0_i32_0 = arith.constant 0 : i32
    %c0_i32_1 = arith.constant 0 : i32
    return %arg1, %c0_i32, %c0_i32_0 : i32, i32, i32
  }
  func.func @transform_11(%arg0: i32, %arg1: i32) -> (i32, i32, i32) {
    %c0_i32 = arith.constant 0 : i32
    %c0_i32_0 = arith.constant 0 : i32
    %c0_i32_1 = arith.constant 0 : i32
    return %arg1, %c0_i32, %c0_i32_0 : i32, i32, i32
  }
  func.func @transform_12(%arg0: i32, %arg1: i32) -> (i32, i32, i32) {
    %c0_i32 = arith.constant 0 : i32
    %c0_i32_0 = arith.constant 0 : i32
    %c0_i32_1 = arith.constant 0 : i32
    return %arg1, %c0_i32, %c0_i32_0 : i32, i32, i32
  }
  func.func @transform_13(%arg0: i32, %arg1: i32) -> (i32, i32, i32) {
    %c0_i32 = arith.constant 0 : i32
    %c0_i32_0 = arith.constant 0 : i32
    %c0_i32_1 = arith.constant 0 : i32
    return %arg1, %c0_i32, %c0_i32_0 : i32, i32, i32
  }
  func.func @transform_14(%arg0: i32, %arg1: i32) -> (i32, i32, i32) {
    %c0_i32 = arith.constant 0 : i32
    %c0_i32_0 = arith.constant 0 : i32
    %c0_i32_1 = arith.constant 0 : i32
    return %arg1, %c0_i32, %c0_i32_0 : i32, i32, i32
  }
  func.func @transform_15(%arg0: i32, %arg1: i32) -> (i32, i32, i32) {
    %c0_i32 = arith.constant 0 : i32
    %c0_i32_0 = arith.constant 0 : i32
    %c0_i32_1 = arith.constant 0 : i32
    return %arg0, %c0_i32, %c0_i32_0 : i32, i32, i32
  }
}

</mosaic_0001>

<bundles_post_ra>
// kernel: bert_model_forward.3
= control target key start
LH: loop header
LB: loop body
LE: loop exit
PB: predicated region body
PF: predicated region fallthrough
CT: control target
= control target key end

     0   :  { %s420_s0 = inlined_call_operand.vmem [shape: bf16[2,128], index: 0, kind: input, shape index: {}]   ;;  %s421_s1 = inlined_call_operand.vmem [shape: bf16[128,128], index: 1, kind: input, shape index: {}]   ;;  %s422_s2 = inlined_call_operand.vmem [shape: f32[1,128], index: 2, kind: input, shape index: {}]   ;;  %s423_s3 = inlined_call_operand.vmem [shape: bf16[128,128], index: 3, kind: input, shape index: {}]   ;;  %s424_s4 = inlined_call_operand.vmem [shape: f32[1,128], index: 4, kind: input, shape index: {}]   ;;  %s425_s5 = inlined_call_operand.hbm [shape: f32[2,128], index: 5, kind: output, shape index: {0}]   ;;  %s426_s6 = inlined_call_operand.vmem [shape: f32[2,128], index: 6, kind: output, shape index: {1}]  }
   0x1   :  { %v281_v0 = vld [vmem:[%s421_s1 + $0x38] sm:$0xff]  ;;  %v280_v1 = vld [vmem:[%s421_s1 + $0x30] sm:$0xff] }
   0x2   :  { %92 = vmatpush.bf16.msra.mxu0 %v281_v0  ;;  %v289_v2 = vld [vmem:[%s423_s3 + $0x38] sm:$0xff]  ;;  %v288_v3 = vld [vmem:[%s423_s3 + $0x30] sm:$0xff] }
   0x3   :  { %176 = vmatpush.bf16.msra.mxu1 %v289_v2 }
   0x4   :  { %12 = vsyncpa [#allocation3], 0  ;;  %v279_v4 = vld [vmem:[%s421_s1 + $0x28] sm:$0xff]  ;;  %v278_v6 = vld [vmem:[%s421_s1 + $0x20] sm:$0xff]  ;;  %s197_s11 = sshll.u32 %s425_s5, 4  ;;  %s198_s11 = int_to_ptr.hbm [resolvable:$true] %s197_s11 }
   0x5   :  { %v287_v5 = vld [vmem:[%s423_s3 + $0x28] sm:$0xff]  ;;  %v286_v7 = vld [vmem:[%s423_s3 + $0x20] sm:$0xff]  ;;  %v277_v8 = vld [vmem:[%s421_s1 + $0x18] sm:$0xff] }
   0x6   :  { %93 = vmatpush.bf16.msra.mxu0 %v280_v1  ;;  %v285_v9 = vld [vmem:[%s423_s3 + $0x18] sm:$0xff]  ;;  %v276_v10 = vld [vmem:[%s421_s1 + $0x10] sm:$0xff]  ;;  %v275_v11 = vld [vmem:[%s421_s1 + $0x8] sm:$0xff] }
   0x7   :  { %177 = vmatpush.bf16.msra.mxu1 %v288_v3  ;;  %v274_v12 = vld [vmem:[%s421_s1] sm:$0xff]  ;;  %v284_v14 = vld [vmem:[%s423_s3 + $0x10] sm:$0xff]  ;;  %v283_v15 = vld [vmem:[%s423_s3 + $0x8] sm:$0xff] }
   0x8   :  { %v23_v13 = vld [vmem:[%s420_s0] sm:$0x1]  ;;  %s321_s0 = smov [#allocation2]  }
   0x9   :  { %v282_v16 = vld [vmem:[%s423_s3] sm:$0xff]  ;;  %s195_s8 = sshll.u32 %s321_s0, 4  ;;  %s196_s8 = int_to_ptr.vmem [resolvable:$true] %s195_s8 }
   0xa   :  { %94 = vmatpush.bf16.msra.mxu0 %v279_v4  ;;  %v291_v17 = vld [vmem:[%s422_s2] ss:$0 sm:$0xff] }
   0xb   :  { %178 = vmatpush.bf16.msra.mxu1 %v287_v5  ;;  %v292_v23 = vld [vmem:[%s424_s4] ss:$0 sm:$0xff] }
   0xe   :  { %95 = vmatpush.bf16.msra.mxu0 %v278_v6 }
   0xf   :  { %179 = vmatpush.bf16.msra.mxu1 %v286_v7 }
  0x12   :  { %96 = vmatpush.bf16.msra.mxu0 %v277_v8 }
  0x13   :  { %180 = vmatpush.bf16.msra.mxu1 %v285_v9 }
  0x16   :  { %97 = vmatpush.bf16.msra.mxu0 %v276_v10 }
  0x17   :  { %181 = vmatpush.bf16.msra.mxu1 %v284_v14 }
  0x1a   :  { %98 = vmatpush.bf16.msra.mxu0 %v275_v11 }
  0x1b   :  { %182 = vmatpush.bf16.msra.mxu1 %v283_v15 }
  0x1e   :  { %99 = vmatpush.bf16.msra.mxu0 %v274_v12 }
  0x1f   :  { %183 = vmatpush.bf16.msra.mxu1 %v282_v16 }
  0x21   :  { %100 = vmatmul.bf16.vlgmr.msra.gmra.mxu0 %v23_v13 }
  0x9e   :  { %v101_v18 = vpop.f32.mrf.mxu0 }
  0x9f   :  { %v102_v19 = vadd.f32 %v291_v17, %v101_v18 }
  0xa1   :  { %293 = vtanh.f32 %v102_v19 }
  0xa6   :  { %v103_v20 = vpop.f32.mrf.mxu0 }
  0xa7   :  { %v294_v21 = vpop.eup %293 }
  0xa8   :  { %106 = vst [vmem:[#allocation2] sm:$0x3] %v294_v21  ;;  %v107_v22 = vpack.c.bf16 %v294_v21, %v294_v21 }
  0xa9   :  { %200 = dma.vmem_to_hbm [thread:$0]  %s196_s8, 32, %s198_s11, [#allocation3]  }
  0xaa   :  { %184 = vmatmul.bf16.vlgmr.msra.gmra.mxu1 %v107_v22 }
 0x127   :  { %v185_v24 = vpop.f32.mrf.mxu1 }
 0x128   :  { %v186_v25 = vadd.f32 %v292_v23, %v185_v24 }
 0x12a   :  { %189 = vst [vmem:[%s426_s6] sm:$0x3] %v186_v25 }
 0x12f   :  { %v187_v26 = vpop.f32.mrf.mxu1 }
 0x130   :  { %319 = dma.done.wait [#allocation3], 32  }
 0x131   :  { %320 = vsyncadd [#allocation3], 4294967264 }
 0x132   :  { %209 = vsyncpa [#allocation3], 1 }

// kernel: bert_model_forward.2
= control target key start
LH: loop header
LB: loop body
LE: loop exit
PB: predicated region body
PF: predicated region fallthrough
CT: control target
= control target key end

     0   :  { %s3765_s0 = inlined_call_operand.vmem [shape: f32[2,8,128], index: 0, kind: input, shape index: {}]   ;;  %s3766_s1 = inlined_call_operand.vmem [shape: f32[1,128], index: 1, kind: input, shape index: {}]   ;;  %s3767_s2 = inlined_call_operand.vmem [shape: f32[1,128], index: 2, kind: input, shape index: {}]   ;;  %s3768_s3 = inlined_call_operand.hbm [shape: bf16[4,128,384], index: 3, kind: input, shape index: {}]   ;;  %s3769_s4 = inlined_call_operand.vmem [shape: f32[4,1,384], index: 4, kind: input, shape index: {}]   ;;  %s3770_s5 = inlined_call_operand.vmem [shape: bf16[4,128,128], index: 5, kind: input, shape index: {}]   ;;  %s3771_s6 = inlined_call_operand.vmem [shape: f32[4,1,128], index: 6, kind: input, shape index: {}]   ;;  %s3772_s7 = inlined_call_operand.vmem [shape: f32[4,1,128], index: 7, kind: input, shape index: {}]   ;;  %s3773_s8 = inlined_call_operand.vmem [shape: f32[4,1,128], index: 8, kind: input, shape index: {}]   ;;  %s3774_s9 = inlined_call_operand.hbm [shape: bf16[4,128,512], index: 9, kind: input, shape index: {}]   ;;  %s3775_s10 = inlined_call_operand.vmem [shape: f32[4,1,512], index: 10, kind: input, shape index: {}]   ;;  %s3776_s11 = inlined_call_operand.hbm [shape: bf16[4,512,128], index: 11, kind: input, shape index: {}]   ;;  %s3777_s12 = inlined_call_operand.vmem [shape: f32[4,1,128], index: 12, kind: input, shape index: {}]   ;;  %s3778_s13 = inlined_call_operand.vmem [shape: f32[4,1,128], index: 13, kind: input, shape index: {}]   ;;  %s3779_s14 = inlined_call_operand.vmem [shape: f32[4,1,128], index: 14, kind: input, shape index: {}]   ;;  %s3780_s15 = inlined_call_operand.vmem [shape: bf16[2,8,128], index: 15, kind: output, shape index: {}]  }
   0x1   :  { %3787 = sst [smem:[#allocation15_spill]] %s3765_s0 }
   0x2   :  { %3788 = sst [smem:[#allocation16_spill]] %s3766_s1 }
   0x3   :  { %3789 = sst [smem:[#allocation17_spill]] %s3767_s2 }
   0x4   :  { %3790 = sst [smem:[#allocation18_spill]] %s3768_s3 }
   0x5   :  { %3791 = sst [smem:[#allocation19_spill]] %s3769_s4 }
   0x6   :  { %3792 = sst [smem:[#allocation20_spill]] %s3770_s5 }
   0x7   :  { %3793 = sst [smem:[#allocation21_spill]] %s3774_s9 }
   0x8   :  { %3794 = sst [smem:[#allocation22_spill]] %s3776_s11 }
   0x9   :  { %3795 = sst [smem:[#allocation23_spill]] %s3777_s12 }
   0xa   :  { %3796 = sst [smem:[#allocation24_spill]] %s3778_s13 }
   0xb   :  { %3797 = sst [smem:[#allocation25_spill]] %s3779_s14 }
   0xc   :  { %3798 = sst [smem:[#allocation26_spill]] %s3780_s15 }
   0xd   :  { %20 = vsyncpa [#allocation4], 0 }
   0xe   :  { %22 = vsyncpa [#allocation4 + $0x1], 0 }
   0xf   :  { %23 = vsyncpa [#allocation6], 0 }
  0x10   :  { %25 = vsyncpa [#allocation6 + $0x1], 0  ;;  %s3278_s18 = smov 0   ;;  %s3280_s19 = smov 0  }
  0x11   :  { %s3282_s20 = smov 0   ;;  %s3284_s21 = smov 0  }
  0x12   :  { %s3286_s22 = smov 0   ;;  %s3288_s23 = smov 0  }
  0x13 LB: > { %3799 = sst [smem:[#allocation10_spill]] %s3171_s19  ;;  %s3782_s24 = sadd.s32 4294967295, %s3187_s23   ;;  %s3187_s23 = sphi %s3288_s23, %s31_s23   ;;  %s3183_s22 = sphi %s3286_s22, %s3829_s22   ;;  %s3179_s21 = sphi %s3284_s21, %s3828_s21   ;;  %s3175_s20 = sphi %s3282_s20, %s3827_s20   ;;  %s3171_s19 = sphi %s3280_s19, %s3826_s19   ;;  %s3167_s18 = sphi %s3278_s18, %s3825_s18  }
  0x14   : > { %3800 = sst [smem:[#allocation11_spill]] %s3175_s20  ;;  %s40_s25 = sadd.s32 1, %s3183_s22 }
  0x15   : > { %3801 = sst [smem:[#allocation12_spill]] %s3183_s22  ;;  %p41_p0 = scmp.ge.s32.totalorder %s40_s25, 4 }
  0x16   : > { %s118_s26 = sadd.s32 1, %s3175_s20  ;;  %p125_p1 = scmp.ne.s32.totalorder %s3175_s20, %s3171_s19 }
  0x17   : > { %p126_p2 = scmp.eq.s32.totalorder %s3187_s23, 0  ;;  %s3831_s25 = smov (%p41_p0, %s40_s25), 0 }
  0x18   : > { %3802 = sst [smem:[#allocation13_spill]] %s3831_s25  ;;  %p131_p4 = scmp.ne.s32.totalorder %s3171_s19, %s3167_s18 }
  0x19   : > { %p127_p3 = por %p126_p2, %p125_p1  ;;  %s115_s27 = ssub.s32 %s3183_s22, %s3831_s25 }
  0x1a   : > { %p132_p5 = scmp.eq.s32.totalorder %s3782_s24, 0  ;;  %p116_p6 = scmp.eq.s32.totalorder %s115_s27, 0 }
  0x1b   : > { %p2929_p8 = scmp.lt.s32.totalorder %s3187_s23, 4  ;;  %s3328_s30 = sand.u32 1, %s3175_s20  }
  0x1c   : > { %p3319_p7 = por %p132_p5, %p131_p4  ;;  %s537_s17 = sand.u32 1, %s3187_s23  }
  0x1d   : > { %s3325_s29 = scalar_select %p116_p6, %s3175_s20, %s118_s26  }
  0x1e   : > { %p3330_p9 = pnand %p2929_p8, %p127_p3  ;;  %s2395_s18 = sshll.u32 %s3328_s30, 8 }
  0x1f   : > { %3804 = sst [smem:[#allocation14_spill]] %s3325_s29  ;;  %s2805_s25 = sshll.u32 %s3183_s22, 8 }
  0x20   : > { %s3806_s9 = sld [smem:[#allocation21_spill]]  ;;  %s541_s2 = scalar_lea.vmem [#allocation5], %s2395_s18 }
  0x21   : > { %s549_s26 = sshll.u32 %s541_s2, 4  ;;  %s3340_s20 = scalar_lea.sflag [#allocation6], %s537_s17  ;;  %s550_s26 = int_to_ptr.vmem [resolvable:$true] %s549_s26 }
  0x22   : > { %s3189_s1 = smov 256   ;;  %s3190_s0 = smov 16  }
  0x23   : > { %s3807_s11 = sld [smem:[#allocation22_spill]]  ;;  %s570_s27 = scalar_lea.vmem [#allocation7], %s2395_s18 }
  0x24   : > { %p2401_p10 = scmp.ge.s32.totalorder %s3187_s23, 1  ;;  %p604_p11 = scmp.lt.s32.totalorder %s3187_s23, 5 }
  0x25   : > { %s3809_s3 = sld [smem:[#allocation18_spill]]  ;;  %s3194_s12 = smov 4  }
  0x26   : > { %s546_s15 = scalar_lea.hbm %s3806_s9, %s2805_s25  ;;  %s578_s9 = sshll.u32 %s570_s27, 4  ;;  %s579_s9 = int_to_ptr.vmem [resolvable:$true] %s578_s9 }
  0x27   : > { %s547_s29 = sshll.u32 %s546_s15, 4  ;;  %p3350_p12 = pnand %p2401_p10, %p604_p11  ;;  %s548_s29 = int_to_ptr.hbm [resolvable:$true] %s547_s29 }
  0x28   : > { %2925 = dma.hbm_to_vmem [thread:$0]  (!%p3330_p9), %s548_s29, 4096, %s550_s26, %s3340_s20, %s3189_s1, %s3189_s1, %s3190_s0  }
  0x29   : > { %s575_s24 = scalar_lea.hbm %s3807_s11, %s2805_s25  ;;  %s2909_s0 = smul.u32 192, %s3328_s30 }
  0x2a   : > { %s576_s2 = sshll.u32 %s575_s24, 4  ;;  %s2910_s1 = smul.u32 192, %s3183_s22  ;;  %s577_s2 = int_to_ptr.hbm [resolvable:$true] %s576_s2 }
  0x2b   : > { %s486_s25 = scalar_lea.vmem [#allocation3], %s2909_s0  ;;  %s483_s26 = scalar_lea.sflag [#allocation4], %s3328_s30 }
  0x2c   : > { %s491_s14 = scalar_lea.hbm %s3809_s3, %s2910_s1  ;;  %s494_s17 = sshll.u32 %s486_s25, 4  ;;  %s495_s17 = int_to_ptr.vmem [resolvable:$true] %s494_s17 }
  0x2d   : > { %s492_s18 = sshll.u32 %s491_s14, 4  ;;  %s3191_s24 = smov 192   ;;  %s493_s18 = int_to_ptr.hbm [resolvable:$true] %s492_s18 }
  0x2e   : > { %s3192_s27 = smov 12   ;;  %s3193_s11 = smov 64  }
  0x2f   : > { %2922 = dma.hbm_to_vmem [thread:$0]  (!%p3330_p9), %s493_s18, 3072, %s495_s17, %s483_s26, %s3191_s24, %s3191_s24, %s3192_s27  }
  0x30   : > { %2928 = dma.hbm_to_vmem [thread:$0]  (!%p3330_p9), %s577_s2, 4096, %s579_s9, %s3340_s20, %s3193_s11, %s3193_s11, %s3194_s12  }
  0x31   : > { %608 = sbr.rel (%p3350_p12) target bundleno = 2292 (0x8f4), region = 80  ;;  %s610_s1 = sand.u32 (!%p3350_p12), 1, %s3171_s19  }
  0x32   : > { %s2911_s0 = smul.u32 (!%p3350_p12), 192, %s610_s1  ;;  %s611_s29 = scalar_lea.sflag (!%p3350_p12), [#allocation4], %s610_s1 }
  0x34   : > { %s3368_s13 = scalar_lea.vmem (!%p3350_p12), [#allocation3], %s2911_s0 }
  0x36   : > { %3158 = dma.done.wait (%p3319_p7), %s611_s29, 3072  }
  0x37   : > { %3160 = vsyncadd (%p3319_p7), %s611_s29, 4294964224  ;;  %s3810_s30 = sadd.s32 4294967295, %s3187_s23   ;;  %s2402_s9 = sshll.u32 %s610_s1, 8 }
  0x38   : > { %s620_s16 = sand.u32 1, %s3810_s30   ;;  %s3376_s12 = scalar_lea.vmem [#allocation5], %s2402_s9 }
  0x39   : > { %s621_s11 = scalar_lea.sflag [#allocation6], %s620_s16 }
  0x3a   : > { %3162 = dma.done.wait (%p3319_p7), %s621_s11, 8192  }
  0x3b   : > { %3164 = vsyncadd (%p3319_p7), %s621_s11, 4294959104  ;;  %p734_p13 = scmp.lt.s32.totalorder %s3179_s21, 3  ;;  %s3811_s5 = sld [smem:[#allocation20_spill]] }
  0x3c   : > { %s3812_s4 = sld [smem:[#allocation19_spill]]  ;;  %s3428_s16 = scalar_lea.vmem [#allocation7], %s2402_s9 }
  0x3d   : > { %s3384_s20 = scalar_select %p734_p13, %s3179_s21, 3 }
  0x3e   : > { %s3813_s26 = sld [smem:[#allocation23_spill]]  ;;  %p2407_p0 = scmp.ne.s32.totalorder %s3179_s21, 0 }
  0x3f   : > { %s2912_s2 = smul.u32 3, %s3384_s20  ;;  %s2807_s15 = sshll.u32 %s3384_s20, 6 }
  0x40   : > { %s751_s3 = scalar_lea.vmem %s3773_s8, %s3384_s20  ;;  %s2406_s14 = sshll.u32 %s3384_s20, 2 }
  0x41   : > { %s3391_s28 = scalar_lea.vmem %s3811_s5, %s2807_s15  ;;  %s3414_s5 = scalar_lea.vmem %s3775_s10, %s2406_s14 }
  0x42   : > { %s3400_s1 = scalar_lea.vmem %s3812_s4, %s2912_s2  ;;  %s3814_s4 = sld [smem:[#allocation24_spill]] }
  0x43   : > { %s3815_s30 = sld [smem:[#allocation25_spill]] }
  0x44   : > { %s758_s24 = scalar_lea.vmem %s3813_s26, %s3384_s20  ;;  %s3816_s15 = sld [smem:[#allocation15_spill]] (!%p2407_p0) }
  0x45   : > { %775 = sbr.rel (%p2407_p0) target bundleno = 350 (0x15e), region = 96  ;;  %s3818_s2 = sld [smem:[#allocation17_spill]] (!%p2407_p0) }
  0x48   : > { %s761_s22 = scalar_lea.vmem %s3814_s4, %s3384_s20 }
  0x49   : > { %s764_s19 = scalar_lea.vmem %s3815_s30, %s3384_s20  ;;  %s3817_s30 = sld [smem:[#allocation16_spill]] (!%p2407_p0) }
  0x4a   : > { %v776_v0 = vld [vmem:[%s3816_s15] sm:$0xff]  ;;  %v777_v1 = vld [vmem:[%s3816_s15 + $0x8] sm:$0xff]  ;;  %v3195_v2 = vmov 128.0  }
  0x4b   : > { %780 = vadd.xlane.f32.xlu0 %v776_v0  ;;  %2989 = vrcp.f32 %v3195_v2  ;;  %v2988_v34 = vld [vmem:[%s3818_s2] ss:$0 sm:$0xff] }
  0x4f   : > { %v2987_v31 = vld [vmem:[%s3817_s30] ss:$0 sm:$0xff] }
  0x51   : > { %v2990_v3 = vpop.eup %2989 }
  0x52   : > { %v785_v4 = vmul.f32 128.0, %v2990_v3  ;;  %vm789_vm0 = vweird.f32 %v2990_v3 }
  0x53   : > { %782 = vadd.xlane.f32.xlu0 %v777_v1 }
  0x54   : > { %v786_v5 = vsub.f32 1.0, %v785_v4 }
  0x56   : > { %v787_v6 = vmul.f32 %v2990_v3, %v786_v5 }
  0x58   : > { %v788_v7 = vadd.f32 %v2990_v3, %v787_v6 }
  0x5a   : > { %v790_v8 = vsel %vm789_vm0, %v2990_v3, %v788_v7 }
  0xbe   : > { %v781_v9 = vpop.xlane.xlu0 %780 }
  0xbf   : > { %v791_v10 = vmul.f32 %v790_v8, %v781_v9 }
  0xc1   : > { %v793_v11 = vsub.f32 %v776_v0, %v791_v10 }
  0xc3   : > { %v795_v12 = vmul.f32 %v793_v11, %v793_v11 }
  0xc5   : > { %797 = vadd.xlane.f32.xlu1 %v795_v12 }
  0xc6   : > { %v783_v13 = vpop.xlane.xlu0 %782 }
  0xc7   : > { %v792_v14 = vmul.f32 %v790_v8, %v783_v13 }
  0xc9   : > { %v794_v15 = vsub.f32 %v777_v1, %v792_v14 }
  0xcb   : > { %v796_v16 = vmul.f32 %v794_v15, %v794_v15 }
  0xcd   : > { %799 = vadd.xlane.f32.xlu1 %v796_v16 }
 0x138   : > { %v798_v17 = vpop.xlane.xlu1 %797 }
 0x139   : > { %v801_v18 = vmul.f32 %v798_v17, %v790_v8 }
 0x13b   : > { %v803_v19 = vadd.f32 1e-12, %v801_v18 }
 0x13d   : > { %2991 = vrsqrt.f32 %v803_v19  ;;  %vm811_vm2 = vweird.f32 %v803_v19 }
 0x140   : > { %v800_v20 = vpop.xlane.xlu1 %799 }
 0x141   : > { %v802_v21 = vmul.f32 %v800_v20, %v790_v8 }
 0x143   : > { %v2992_v22 = vpop.eup %2991  ;;  %v804_v23 = vadd.f32 1e-12, %v802_v21 }
 0x144   : > { %v806_v24 = vmul.f32 %v2992_v22, %v803_v19  ;;  %vm812_vm1 = vweird.f32 %v2992_v22 }
 0x145   : > { %2993 = vrsqrt.f32 %v804_v23  ;;  %vm813_vm3 = vmor %vm811_vm2, %vm812_vm1  ;;  %vm821_vm5 = vweird.f32 %v804_v23 }
 0x146   : > { %v807_v25 = vmul.f32 %v2992_v22, %v806_v24 }
 0x148   : > { %v808_v26 = vmul.f32 0.5, %v807_v25 }
 0x14a   : > { %v809_v27 = vsub.f32 1.5, %v808_v26 }
 0x14b   : > { %v2994_v28 = vpop.eup %2993 }
 0x14c   : > { %v810_v29 = vmul.f32 %v2992_v22, %v809_v27  ;;  %v816_v30 = vmul.f32 %v2994_v28, %v804_v23  ;;  %vm822_vm4 = vweird.f32 %v2994_v28 }
 0x14d   : > { %vm823_vm6 = vmor %vm821_vm5, %vm822_vm4 }
 0x14e   : > { %v814_v32 = vsel %vm813_vm3, %v2992_v22, %v810_v29  ;;  %v817_v33 = vmul.f32 %v2994_v28, %v816_v30 }
 0x14f   : > { %v825_v35 = vmul.f32 %v814_v32, %v793_v11 }
 0x150   : > { %v818_v36 = vmul.f32 0.5, %v817_v33 }
 0x151   : > { %v830_v37 = vmul.f32 %v2987_v31, %v825_v35 }
 0x152   : > { %v819_v38 = vsub.f32 1.5, %v818_v36 }
 0x153   : > { %v835_v39 = vadd.f32 %v2988_v34, %v830_v37 }
 0x154   : > { %v820_v40 = vmul.f32 %v2994_v28, %v819_v38 }
 0x155   : > { %837 = vst [vmem:[#allocation2] sm:$0xff] %v835_v39 }
 0x156   : > { %v824_v41 = vsel %vm823_vm6, %v2994_v28, %v820_v40 }
 0x157   : > { %v826_v42 = vmul.f32 %v824_v41, %v794_v15 }
 0x159   : > { %v831_v43 = vmul.f32 %v2987_v31, %v826_v42 }
 0x15b   : > { %v836_v44 = vadd.f32 %v2988_v34, %v831_v43 }
 0x15d   : > { %838 = vst [vmem:[#allocation2 + $0x8] sm:$0xff] %v836_v44 }
 0x15e PF: > { %v2494_v45 = vld [vmem:[%s3368_s13 + $0xa8] sm:$0xf]  ;;  %v2830_v46 = vld [vmem:[%s3368_s13 + $0xb0] sm:$0xf0]  ;;  %v2829_v47 = vld [vmem:[%s3368_s13 + $0xac] sm:$0xf]  ;;  %s3819_s0 = scalar_lea.vmem %s3771_s6, %s3384_s20  ;;  %s3820_s29 = scalar_lea.vmem %s3772_s7, %s3384_s20 }
 0x15f   : > { %v2495_v48 = vor.u32 %v2830_v46, %v2494_v45  ;;  %v2496_v49 = vld [vmem:[%s3368_s13 + $0xb4] sm:$0xf0]  ;;  %v2482_v50 = vld [vmem:[%s3368_s13 + $0x90] sm:$0xf]  ;;  %v2827_v51 = vld [vmem:[%s3368_s13 + $0x98] sm:$0xf0] }
 0x160   : > { %v2499_v52 = vor.u32 %v2829_v47, %v2496_v49  ;;  %v2826_v53 = vld [vmem:[%s3368_s13 + $0x94] sm:$0xf]  ;;  %v2484_v54 = vld [vmem:[%s3368_s13 + $0x9c] sm:$0xf0]  ;;  %v2483_v55 = vor.u32 %v2827_v51, %v2482_v50  ;;  %v2470_v57 = vld [vmem:[%s3368_s13 + $0x78] sm:$0xf] }
 0x161   : > { %1010 = vmatpush.bf16.msra.mxu0 %v2495_v48  ;;  %v2487_v56 = vor.u32 %v2826_v53, %v2484_v54  ;;  %v2824_v58 = vld [vmem:[%s3368_s13 + $0x80] sm:$0xf0]  ;;  %v2823_v59 = vld [vmem:[%s3368_s13 + $0x7c] sm:$0xf]  ;;  %v2472_v60 = vld [vmem:[%s3368_s13 + $0x84] sm:$0xf0] }
 0x162   : > { %1024 = vmatpush.bf16.msra.mxu1 %v2499_v52  ;;  %v2471_v61 = vor.u32 %v2824_v58, %v2470_v57  ;;  %v2475_v62 = vor.u32 %v2823_v59, %v2472_v60  ;;  %v2458_v63 = vld [vmem:[%s3368_s13 + $0x60] sm:$0xf]  ;;  %v2821_v0 = vld [vmem:[%s3368_s13 + $0x68] sm:$0xf0]  ;;  %v2820_v1 = vld [vmem:[%s3368_s13 + $0x64] sm:$0xf] }
 0x163   : > { %v2460_v2 = vld [vmem:[%s3368_s13 + $0x6c] sm:$0xf0]  ;;  %v2446_v3 = vld [vmem:[%s3368_s13 + $0x48] sm:$0xf]  ;;  %v2459_v4 = vor.u32 %v2821_v0, %v2458_v63  ;;  %v2818_v5 = vld [vmem:[%s3368_s13 + $0x50] sm:$0xf0] }
 0x164   : > { %v2817_v6 = vld [vmem:[%s3368_s13 + $0x4c] sm:$0xf]  ;;  %v2463_v7 = vor.u32 %v2820_v1, %v2460_v2  ;;  %v2448_v8 = vld [vmem:[%s3368_s13 + $0x54] sm:$0xf0]  ;;  %v2447_v9 = vor.u32 %v2818_v5, %v2446_v3  ;;  %v2434_v11 = vld [vmem:[%s3368_s13 + $0x30] sm:$0xf] }
 0x165   : > { %1011 = vmatpush.bf16.msra.mxu0 %v2483_v55  ;;  %v2451_v10 = vor.u32 %v2817_v6, %v2448_v8  ;;  %v2815_v12 = vld [vmem:[%s3368_s13 + $0x38] sm:$0xf0]  ;;  %v2814_v13 = vld [vmem:[%s3368_s13 + $0x34] sm:$0xf]  ;;  %v2436_v14 = vld [vmem:[%s3368_s13 + $0x3c] sm:$0xf0] }
 0x166   : > { %1025 = vmatpush.bf16.msra.mxu1 %v2487_v56  ;;  %v2435_v15 = vor.u32 %v2815_v12, %v2434_v11  ;;  %v2439_v16 = vor.u32 %v2814_v13, %v2436_v14  ;;  %v2422_v17 = vld [vmem:[%s3368_s13 + $0x18] sm:$0xf]  ;;  %v2812_v18 = vld [vmem:[%s3368_s13 + $0x20] sm:$0xf0]  ;;  %v2811_v19 = vld [vmem:[%s3368_s13 + $0x1c] sm:$0xf] }
 0x167   : > { %v2424_v20 = vld [vmem:[%s3368_s13 + $0x24] sm:$0xf0]  ;;  %v2423_v21 = vor.u32 %v2812_v18, %v2422_v17  ;;  %v2410_v23 = vld [vmem:[%s3368_s13] sm:$0xf]  ;;  %v2809_v24 = vld [vmem:[%s3368_s13 + $0x8] sm:$0xf0] }
 0x168   : > { %v2427_v22 = vor.u32 %v2811_v19, %v2424_v20  ;;  %v2808_v25 = vld [vmem:[%s3368_s13 + $0x4] sm:$0xf]  ;;  %v2412_v26 = vld [vmem:[%s3368_s13 + $0xc] sm:$0xf0]  ;;  %v2411_v27 = vor.u32 %v2809_v24, %v2410_v23  ;;  %v3477_v29 = vld [vmem:[#allocation2 + $0x8] sm:$0xff]  ;;  %vm1060_vm7 = vcmask 523264  }
 0x169   : > { %1012 = vmatpush.bf16.msra.mxu0 %v2471_v61  ;;  %v3475_v28 = vld [vmem:[#allocation2] sm:$0xff]  ;;  %v2415_v30 = vor.u32 %v2808_v25, %v2412_v26  ;;  %v2831_v37 = vld [vmem:[%s3368_s13 + $0xb8] sm:$0xf0]  ;;  %v2490_v38 = vld [vmem:[%s3368_s13 + $0x98] sm:$0xf]  ;;  %vm1101_vm8 = vcmask 64512  }
 0x16a   : > { %1026 = vmatpush.bf16.msra.mxu1 %v2475_v62  ;;  %v3481_v31 = vpack.c.bf16 %v3477_v29, %v3475_v28  ;;  %v3486_v32 = vld [vmem:[%s3400_s1] sm:$0x7]  ;;  %v2828_v42 = vld [vmem:[%s3368_s13 + $0xa0] sm:$0xf0]  ;;  %v2478_v46 = vld [vmem:[%s3368_s13 + $0x80] sm:$0xf] }
 0x16b   : > { %v876_v33 = vperm.slane %v3486_v32, 0  ;;  %v877_v34 = vperm.slane %v3486_v32, 1  ;;  %v2502_v36 = vld [vmem:[%s3368_s13 + $0xb0] sm:$0xf]  ;;  %v2491_v44 = vor.u32 %v2828_v42, %v2490_v38  ;;  %v2825_v47 = vld [vmem:[%s3368_s13 + $0x88] sm:$0xf0] }
 0x16c   : > { %v2503_v41 = vor.u32 %v2831_v37, %v2502_v36  ;;  %s3196_s1 = smov 64   ;;  %v2479_v49 = vor.u32 %v2825_v47, %v2478_v46  ;;  %v2466_v53 = vld [vmem:[%s3368_s13 + $0x68] sm:$0xf]  ;;  %v2822_v54 = vld [vmem:[%s3368_s13 + $0x70] sm:$0xf0]  ;;  %v878_v25 = vperm.slane %v3486_v32, 2 }
 0x16d   : > { %1013 = vmatpush.bf16.msra.mxu0 %v2459_v4  ;;  %v2467_v58 = vor.u32 %v2822_v54, %v2466_v53  ;;  %v2454_v61 = vld [vmem:[%s3368_s13 + $0x50] sm:$0xf]  ;;  %v2819_v62 = vld [vmem:[%s3368_s13 + $0x58] sm:$0xf0]  ;;  %v2442_v3 = vld [vmem:[%s3368_s13 + $0x38] sm:$0xf] }
 0x16e   : > { %1027 = vmatpush.bf16.msra.mxu1 %v2463_v7  ;;  %1038 = vmatpush.bf16.msra.mxu2 %v2503_v41  ;;  %v2455_v0 = vor.u32 %v2819_v62, %v2454_v61  ;;  %v2816_v4 = vld [vmem:[%s3368_s13 + $0x40] sm:$0xf0]  ;;  %v2430_v7 = vld [vmem:[%s3368_s13 + $0x20] sm:$0xf]  ;;  %v2813_v8 = vld [vmem:[%s3368_s13 + $0x28] sm:$0xf0] }
 0x16f   : > { %v2443_v5 = vor.u32 %v2816_v4, %v2442_v3  ;;  %v2810_v11 = vld [vmem:[%s3368_s13 + $0x10] sm:$0xf0]  ;;  %vm1129_vm9 = vcmask 1043456   ;;  %p2800_p1 = scmp.ne.s32.totalorder %s3179_s21, 3 }
 0x170   : > { %s3824_s20 = sld [smem:[#allocation26_spill]] (!%p2800_p1) }
 0x171   : > { %1014 = vmatpush.bf16.msra.mxu0 %v2447_v9  ;;  %v2431_v9 = vor.u32 %v2813_v8, %v2430_v7 }
 0x172   : > { %1028 = vmatpush.bf16.msra.mxu1 %v2451_v10  ;;  %1039 = vmatpush.bf16.msra.mxu2 %v2491_v44  ;;  %v2418_v10 = vld [vmem:[%s3368_s13 + $0x8] sm:$0xf] }
 0x173   : > { %v2419_v12 = vor.u32 %v2810_v11, %v2418_v10 }
 0x175   : > { %1015 = vmatpush.bf16.msra.mxu0 %v2435_v15 }
 0x176   : > { %1029 = vmatpush.bf16.msra.mxu1 %v2439_v16  ;;  %1040 = vmatpush.bf16.msra.mxu2 %v2479_v49 }
 0x179   : > { %1016 = vmatpush.bf16.msra.mxu0 %v2423_v21 }
 0x17a   : > { %1030 = vmatpush.bf16.msra.mxu1 %v2427_v22  ;;  %1041 = vmatpush.bf16.msra.mxu2 %v2467_v58 }
 0x17d   : > { %1017 = vmatpush.bf16.msra.mxu0 %v2411_v27 }
 0x17e   : > { %1031 = vmatpush.bf16.msra.mxu1 %v2415_v30  ;;  %1042 = vmatpush.bf16.msra.mxu2 %v2455_v0 }
 0x180   : > { %1018 = vmatmul.bf16.vlgmr.msra.gmra.mxu0 %v3481_v31 }
 0x181   : > { %1032 = vmatmul.bf16.vlgmr.msra.gmra.mxu1 %v3481_v31 }
 0x182   : > { %1043 = vmatpush.bf16.msra.mxu2 %v2443_v5 }
 0x186   : > { %1044 = vmatpush.bf16.msra.mxu2 %v2431_v9 }
 0x18a   : > { %1045 = vmatpush.bf16.msra.mxu2 %v2419_v12 }
 0x18d   : > { %1046 = vmatmul.bf16.vlgmr.msra.gmra.mxu2 %v3481_v31 }
 0x1fd   : > { %v1019_v35 = vpop.f32.mrf.mxu0 }
 0x1fe   : > { %v1020_v39 = vadd.f32 %v1019_v35, %v876_v33  ;;  %v1033_v40 = vpop.f32.mrf.mxu1 }
 0x1ff   : > { %v1034_v43 = vadd.f32 %v1033_v40, %v877_v34 }
 0x201   : > { %v1052_v45 = vpack.c.bf16 %v1034_v43, %v1020_v39 }
 0x203   : > { %1167 = vrot.lane.b32.xlu0 %v1052_v45, %s3196_s1  ;;  %v1058_v48 = vrot.slane %v1052_v45, 4  ;;  %v1173_v52 = vunpack.c.l.b16 %v1052_v45 }
 0x205   : > { %v1021_v50 = vpop.f32.mrf.mxu0  ;;  %v1065_v51 = vsel %vm1060_vm7, %v1058_v48, 0  ;;  %v1174_v60 = vpack.c.b16 %v1173_v52, %v1173_v52 }
 0x206   : > { %v1022_v55 = vadd.f32 %v1021_v50, %v876_v33  ;;  %v1035_v56 = vpop.f32.mrf.mxu1  ;;  %1074 = vmatpush.bf16.xpose.msra.mxu3 %v1065_v51 }
 0x207   : > { %v1036_v57 = vadd.f32 %v1035_v56, %v877_v34 }
 0x209   : > { %v1054_v59 = vpack.c.bf16 %v1036_v57, %v1022_v55 }
 0x20b   : > { %1169 = vrot.lane.b32.xlu1 %v1054_v59, %s3196_s1  ;;  %1175 = vrot.lane.b32.xlu0 %v1174_v60, %s3196_s1  ;;  %v1059_v63 = vrot.slane %v1054_v59, 4  ;;  %v1196_v2 = vunpack.c.l.b16 %v1054_v59 }
 0x20d   : > { %2504 = vmatmul.msk.bf16.vlgmr.msra.gmra.mxu3 %vm1060_vm7, %v1052_v45  ;;  %v1084_v1 = vsel %vm1060_vm7, %v1059_v63, 0  ;;  %v1197_v6 = vpack.c.b16 %v1196_v2, %v1196_v2 }
 0x20e   : > { %1093 = vmatpush.bf16.xpose.msrb.mxu3 %v1084_v1 }
 0x210   : > { %v1047_v30 = vpop.f32.mrf.mxu2 }
 0x211   : > { %v1048_v33 = vadd.f32 %v1047_v30, %v878_v25 }
 0x213   : > { %1198 = vrot.lane.b32.xlu1 %v1197_v6, %s3196_s1  ;;  %v3522_v34 = vpack.c.bf16 %v1048_v33, %v1048_v33 }
 0x215   : > { %v1131_v35 = vsel %vm1129_vm9, %v3522_v34, 0 }
 0x216   : > { %1140 = vmatpush.bf16.msra.mxu3 %v1131_v35 }
 0x218   : > { %v1049_v37 = vpop.f32.mrf.mxu2 }
 0x219   : > { %v1050_v38 = vadd.f32 %v1049_v37, %v878_v25 }
 0x21b   : > { %v1055_v39 = vpack.c.bf16 %v1050_v38, %v1050_v38 }
 0x21d   : > { %2505 = vmatmul.msk.bf16.vlgmr.msrb.gmra.mxu3 %vm1060_vm7, %v1054_v59  ;;  %v1150_v32 = vsel %vm1129_vm9, %v1055_v39, 0  ;;  %v1270_v51 = vunpack.c.l.b16 %v1055_v39 }
 0x21e   : > { %1159 = vmatpush.bf16.msrb.mxu0 %v1150_v32  ;;  %v2839_v32 = vld [vmem:[%s3391_s28 + $0x38] sm:$0xff] }
 0x21f   : > { %v1271_v55 = vpack.c.b16 %v1270_v51, %v1270_v51  ;;  %1379 = vmatpush.bf16.msrb.mxu1 %v2839_v32  ;;  %v2832_v51 = vld [vmem:[%s3391_s28] sm:$0xff] }
 0x275   : > { %v1168_v13 = vpop.permute.xlu0 %1167 }
 0x276   : > { %v1171_v14 = vrot.slane %v1168_v13, 4 }
 0x278   : > { %v1181_v15 = vsel %vm1060_vm7, %v1171_v14, 0 }
 0x279   : > { %1190 = vmatpush.bf16.xpose.msrb.mxu2 %v1181_v15 }
 0x27d   : > { %v1170_v16 = vpop.permute.xlu1 %1169  ;;  %v1176_v18 = vpop.permute.xlu0 %1175 }
 0x27e   : > { %v1172_v17 = vrot.slane %v1170_v16, 4  ;;  %v1246_v16 = vunpack.c.l.b16 %v3522_v34 }
 0x280   : > { %v1204_v19 = vsel %vm1060_vm7, %v1172_v17, 0  ;;  %2508 = vmatmul.msk.bf16.vlgmr.msrb.gmra.mxu2 %vm1060_vm7, %v1176_v18  ;;  %v1247_v17 = vpack.c.b16 %v1246_v16, %v1246_v16  ;;  %v2868_v16 = vld [vmem:[%s3376_s12 + $0xe4] sm:$0xf] }
 0x281   : > { %1213 = vmatpush.bf16.xpose.msra.mxu2 %v1204_v19 }
 0x285   : > { %v1199_v20 = vpop.permute.xlu1 %1198 }
 0x290   : > { %v1076_v21 = vpop.f32.mrf.mxu3  ;;  %2509 = vmatmul.msk.bf16.vlgmr.msra.gmra.mxu2 %vm1060_vm7, %v1199_v20 }
 0x291   : > { %v1099_v22 = vmul.f32 0.125, %v1076_v21 }
 0x293   : > { %v1102_v23 = vsel %vm1101_vm8, %v1099_v22, -inf }
 0x294   : > { %1103 = vmax.xlane.f32.xlu2 %v1102_v23 }
 0x298   : > { %v1078_v24 = vpop.f32.mrf.mxu3 }
 0x2a0   : > { %v1095_v26 = vpop.f32.mrf.mxu3 }
 0x2a1   : > { %v1100_v27 = vmul.f32 0.125, %v1095_v26 }
 0x2a3   : > { %v1105_v31 = vsel %vm1101_vm8, %v1100_v27, -inf }
 0x2a4   : > { %1106 = vmax.xlane.f32.xlu2 %v1105_v31 }
 0x2a8   : > { %v1097_v36 = vpop.f32.mrf.mxu3 }
 0x303   : > { %v1192_v40 = vpop.f32.mrf.mxu2 }
 0x304   : > { %v1219_v41 = vmul.f32 0.125, %v1192_v40  ;;  %v2838_v40 = vld [vmem:[%s3391_s28 + $0x30] sm:$0xff] }
 0x305   : > { %1380 = vmatpush.bf16.msrb.mxu1 %v2838_v40  ;;  %v2626_v40 = vld [vmem:[%s3376_s12 + $0xa0] sm:$0xf] }
 0x306   : > { %v1221_v42 = vsel %vm1101_vm8, %v1219_v41, -inf }
 0x307   : > { %1222 = vmax.xlane.f32.xlu0 %v1221_v42  ;;  %v1104_v43 = vpop.xlane.xlu2 %1103  ;;  %v2836_v42 = vld [vmem:[%s3391_s28 + $0x20] sm:$0xff] }
 0x308   : > { %v1108_v44 = vsub.f32 %v1099_v22, %v1104_v43  ;;  %v2835_v43 = vld [vmem:[%s3391_s28 + $0x18] sm:$0xff] }
 0x30a   : > { %v1110_v45 = vmul.f32 1.442695, %v1108_v44 }
 0x30b   : > { %v1194_v46 = vpop.f32.mrf.mxu2 }
 0x30c   : > { %3001 = vpow2.f32 %v1110_v45  ;;  %v2834_v45 = vld [vmem:[%s3391_s28 + $0x10] sm:$0xff]  ;;  %v2833_v46 = vld [vmem:[%s3391_s28 + $0x8] sm:$0xff] }
 0x312   : > { %v3002_v47 = vpop.eup %3001 }
 0x313   : > { %v1215_v48 = vpop.f32.mrf.mxu2  ;;  %v1114_v49 = vsel %vm1101_vm8, %v3002_v47, 0.0 }
 0x314   : > { %v1220_v50 = vmul.f32 0.125, %v1215_v48  ;;  %1115 = vadd.xlane.f32.xlu2 %v1114_v49 }
 0x316   : > { %v1224_v52 = vsel %vm1101_vm8, %v1220_v50, -inf }
 0x317   : > { %1225 = vmax.xlane.f32.xlu1 %v1224_v52  ;;  %v1107_v53 = vpop.xlane.xlu2 %1106 }
 0x318   : > { %v1109_v54 = vsub.f32 %v1100_v27, %v1107_v53 }
 0x31a   : > { %v1112_v56 = vmul.f32 1.442695, %v1109_v54 }
 0x31b   : > { %1272 = vrot.lane.b32.xlu0 %v1271_v55, %s3196_s1  ;;  %v1217_v57 = vpop.f32.mrf.mxu2 }
 0x31c   : > { %3003 = vpow2.f32 %v1112_v56 }
 0x322   : > { %v3004_v58 = vpop.eup %3003 }
 0x323   : > { %v1117_v59 = vsel %vm1101_vm8, %v3004_v58, 0.0 }
 0x324   : > { %1118 = vadd.xlane.f32.xlu2 %v1117_v59 }
 0x37a   : > { %v1223_v60 = vpop.xlane.xlu0 %1222 }
 0x37b   : > { %v1227_v61 = vsub.f32 %v1219_v41, %v1223_v60  ;;  %v2837_v41 = vld [vmem:[%s3391_s28 + $0x28] sm:$0xff] }
 0x37c   : > { %1381 = vmatpush.bf16.msrb.mxu1 %v2837_v41  ;;  %v2862_v41 = vld [vmem:[%s3376_s12 + $0xac] sm:$0xf0] }
 0x37d   : > { %v1229_v62 = vmul.f32 1.442695, %v1227_v61 }
 0x37f   : > { %3005 = vpow2.f32 %v1229_v62 }
 0x380   : > { %1382 = vmatpush.bf16.msrb.mxu1 %v2836_v42  ;;  %v2860_v42 = vld [vmem:[%s3376_s12 + $0xa4] sm:$0xf] }
 0x384   : > { %1383 = vmatpush.bf16.msrb.mxu1 %v2835_v43  ;;  %v2627_v43 = vor.u32 %v2862_v41, %v2626_v40  ;;  %v2842_v41 = vld [vmem:[%s3376_s12 + $0xc] sm:$0xf0] }
 0x385   : > { %v3006_v63 = vpop.eup %3005 }
 0x386   : > { %v1233_v0 = vsel %vm1101_vm8, %v3006_v63, 0.0 }
 0x387   : > { %1234 = vadd.xlane.f32.xlu2 %v1233_v0  ;;  %v1116_v1 = vpop.xlane.xlu2 %1115 }
 0x388   : > { %3007 = vrcp.f32 %v1116_v1  ;;  %1384 = vmatpush.bf16.msrb.mxu1 %v2834_v45  ;;  %v3197_v1 = vmov 128.0   ;;  %v2634_v45 = vld [vmem:[%s3376_s12 + $0xa8] sm:$0xf] }
 0x38a   : > { %v1226_v2 = vpop.xlane.xlu1 %1225 }
 0x38b   : > { %v1228_v3 = vsub.f32 %v1220_v50, %v1226_v2 }
 0x38c   : > { %1385 = vmatpush.bf16.msrb.mxu1 %v2833_v46  ;;  %v2863_v46 = vld [vmem:[%s3376_s12 + $0xb4] sm:$0xf0] }
 0x38d   : > { %v1231_v4 = vmul.f32 1.442695, %v1228_v3  ;;  %v1273_v5 = vpop.permute.xlu0 %1272 }
 0x38e   : > { %v3008_v6 = vpop.eup %3007  ;;  %v1278_v7 = vsel %vm1129_vm9, %v1273_v5, 0 }
 0x38f   : > { %v1122_v8 = vmul.f32 %v3008_v6, %v3002_v47  ;;  %3009 = vpow2.f32 %v1231_v4  ;;  %1287 = vmatpush.bf16.msra.mxu0 %v1278_v7 }
 0x390   : > { %1386 = vmatpush.bf16.msrb.mxu1 %v2832_v51 }
 0x391   : > { %v1124_v9 = vpack.c.bf16 %v1122_v8, %v1122_v8 }
 0x393   : > { %2506 = vmatmul.msk.bf16.vlgmr.msra.gmra.mxu3 %vm1101_vm8, %v1124_v9 }
 0x395   : > { %v3010_v10 = vpop.eup %3009 }
 0x396   : > { %v1236_v11 = vsel %vm1101_vm8, %v3010_v10, 0.0 }
 0x397   : > { %1237 = vadd.xlane.f32.xlu2 %v1236_v11  ;;  %v1119_v12 = vpop.xlane.xlu2 %1118 }
 0x398   : > { %3011 = vrcp.f32 %v1119_v12 }
 0x39e   : > { %v3012_v13 = vpop.eup %3011 }
 0x39f   : > { %v1123_v14 = vmul.f32 %v3012_v13, %v3004_v58  ;;  %v2995_v58 = vld [vmem:[%s3819_s0] ss:$0 sm:$0xff] }
 0x3a1   : > { %v1125_v15 = vpack.c.bf16 %v1123_v14, %v1123_v14  ;;  %v2658_v14 = vld [vmem:[%s3376_s12 + $0xe0] sm:$0xf] }
 0x3a3   : > { %2507 = vmatmul.msk.bf16.vlgmr.msrb.gmra.mxu0 %vm1101_vm8, %v1125_v15  ;;  %v2870_v15 = vld [vmem:[%s3376_s12 + $0xec] sm:$0xf0] }
 0x3af   : > { %1248 = vrot.lane.b32.xlu2 %v1247_v17, %s3196_s1  ;;  %v2659_v17 = vor.u32 %v2870_v15, %v2658_v14  ;;  %v2850_v14 = vld [vmem:[%s3376_s12 + $0x4c] sm:$0xf0]  ;;  %v2848_v15 = vld [vmem:[%s3376_s12 + $0x44] sm:$0xf] }
 0x3b1   : > { %1657 = vmatpush.bf16.msrb.mxu2 %v2659_v17  ;;  %v2580_v17 = vld [vmem:[%s3376_s12 + $0x50] sm:$0xf0] }
 0x3fa   : > { %v1235_v18 = vpop.xlane.xlu2 %1234 }
 0x3fb   : > { %3013 = vrcp.f32 %v1235_v18  ;;  %v2660_v18 = vld [vmem:[%s3376_s12 + $0xf0] sm:$0xf0] }
 0x401   : > { %v3014_v20 = vpop.eup %3013 }
 0x402   : > { %v1241_v22 = vmul.f32 %v3014_v20, %v3006_v63  ;;  %v2871_v20 = vld [vmem:[%s3376_s12 + $0xf4] sm:$0xf0] }
 0x404   : > { %v1243_v27 = vpack.c.bf16 %v1241_v22, %v1241_v22 }
 0x40a   : > { %v1238_v19 = vpop.xlane.xlu2 %1237 }
 0x40b   : > { %3015 = vrcp.f32 %v1238_v19  ;;  %v2666_v19 = vld [vmem:[%s3376_s12 + $0xe8] sm:$0xf] }
 0x40c   : > { %3017 = vrcp.f32 %v3197_v1  ;;  %v2667_v22 = vor.u32 %v2871_v20, %v2666_v19  ;;  %v2854_v1 = vld [vmem:[%s3376_s12 + $0x6c] sm:$0xf0]  ;;  %v2851_v19 = vld [vmem:[%s3376_s12 + $0x54] sm:$0xf0]  ;;  %v2583_v20 = vor.u32 %v2848_v15, %v2580_v17 }
 0x40d   : > { %v2894_v17 = vld [vmem:[%s3428_s16 + $0xb0] sm:$0xff] }
 0x40e   : > { %1685 = vmatpush.bf16.msrb.mxu0 %v2667_v22  ;;  %v2849_v22 = vld [vmem:[%s3376_s12 + $0x4c] sm:$0xf] }
 0x411   : > { %v3016_v21 = vpop.eup %3015 }
 0x412   : > { %v1242_v23 = vmul.f32 %v3016_v21, %v3010_v10  ;;  %v1249_v24 = vpop.permute.xlu2 %1248  ;;  %v3018_v2 = vpop.eup %3017  ;;  %v2663_v21 = vor.u32 %v2868_v16, %v2660_v18  ;;  %v2586_v18 = vld [vmem:[%s3376_s12 + $0x48] sm:$0xf] }
 0x413   : > { %v1254_v25 = vsel %vm1129_vm9, %v1249_v24, 0  ;;  %v1402_v3 = vmul.f32 128.0, %v3018_v2  ;;  %vm1406_vm10 = vweird.f32 %v3018_v2  ;;  %v2668_v24 = vld [vmem:[%s3376_s12 + $0xf8] sm:$0xf0] }
 0x414   : > { %v1244_v26 = vpack.c.bf16 %v1242_v23, %v1242_v23  ;;  %1263 = vmatpush.bf16.msrb.mxu3 %v1254_v25  ;;  %v2869_v23 = vld [vmem:[%s3376_s12 + $0xec] sm:$0xf] }
 0x415   : > { %v1403_v4 = vsub.f32 1.0, %v1402_v3  ;;  %v2671_v25 = vor.u32 %v2869_v23, %v2668_v24  ;;  %v2588_v23 = vld [vmem:[%s3376_s12 + $0x58] sm:$0xf0] }
 0x416   : > { %v1142_v30 = vpop.f32.mrf.mxu3  ;;  %2511 = vmatmul.msk.bf16.vlgmr.msra.gmra.mxu0 %vm1101_vm8, %v1244_v26  ;;  %v2642_v26 = vld [vmem:[%s3376_s12 + $0xc0] sm:$0xf]  ;;  %v2591_v24 = vor.u32 %v2849_v22, %v2588_v23  ;;  %v2901_v22 = vld [vmem:[%s3428_s16 + $0xe8] sm:$0xff]  ;;  %v2878_v23 = vld [vmem:[%s3428_s16 + $0x30] sm:$0xff] }
 0x417   : > { %2510 = vmatmul.msk.bf16.vlgmr.msrb.gmra.mxu3 %vm1101_vm8, %v1243_v27  ;;  %v1165_v33 = vpack.c.bf16 %v1142_v30, %v1142_v30  ;;  %v1404_v5 = vmul.f32 %v3018_v2, %v1403_v4  ;;  %v2866_v27 = vld [vmem:[%s3376_s12 + $0xcc] sm:$0xf0]  ;;  %v2864_v30 = vld [vmem:[%s3376_s12 + $0xc4] sm:$0xf]  ;;  %1699 = vmatpush.bf16.msra.mxu1 %v2671_v25  ;;  %v2596_v4 = vld [vmem:[%s3376_s12 + $0x70] sm:$0xf0] }
 0x418   : > { %1671 = vmatpush.bf16.msra.mxu3 %v2663_v21  ;;  %v2587_v21 = vor.u32 %v2851_v19, %v2586_v18  ;;  %v2562_v25 = vld [vmem:[%s3376_s12 + $0x20] sm:$0xf]  ;;  %v2902_v18 = vld [vmem:[%s3428_s16 + $0xf0] sm:$0xff]  ;;  %v2879_v19 = vld [vmem:[%s3428_s16 + $0x38] sm:$0xff] }
 0x419   : > { %v1297_v36 = vunpack.c.l.b16 %v1165_v33  ;;  %v1405_v6 = vadd.f32 %v3018_v2, %v1404_v5  ;;  %v2644_v33 = vld [vmem:[%s3376_s12 + $0xd0] sm:$0xf0]  ;;  %v2602_v5 = vld [vmem:[%s3376_s12 + $0x68] sm:$0xf] }
 0x41b   : > { %v3559_v7 = vsel %vm1406_vm10, %v3018_v2, %v1405_v6  ;;  %v2852_v2 = vld [vmem:[%s3376_s12 + $0x64] sm:$0xf]  ;;  %v2855_v6 = vld [vmem:[%s3376_s12 + $0x74] sm:$0xf0] }
 0x41e   : > { %v1144_v31 = vpop.f32.mrf.mxu3 }
 0x41f   : > { %v2643_v31 = vor.u32 %v2866_v27, %v2642_v26  ;;  %v2846_v26 = vld [vmem:[%s3376_s12 + $0x2c] sm:$0xf0]  ;;  %v2844_v27 = vld [vmem:[%s3376_s12 + $0x24] sm:$0xf] }
 0x420   : > { %v1161_v34 = vpop.f32.mrf.mxu0 }
 0x421   : > { %v1166_v35 = vpack.c.bf16 %v1161_v34, %v1161_v34  ;;  %v2650_v34 = vld [vmem:[%s3376_s12 + $0xc8] sm:$0xf]  ;;  %1658 = vmatpush.bf16.msrb.mxu2 %v2643_v31  ;;  %v2564_v31 = vld [vmem:[%s3376_s12 + $0x30] sm:$0xf0] }
 0x423   : > { %v1298_v37 = vunpack.c.l.b16 %v1166_v35  ;;  %v2867_v35 = vld [vmem:[%s3376_s12 + $0xd4] sm:$0xf0] }
 0x425   : > { %v1299_v38 = vpack.c.b16 %v1298_v37, %v1297_v36  ;;  %v2647_v36 = vor.u32 %v2864_v30, %v2644_v33  ;;  %v2651_v37 = vor.u32 %v2867_v35, %v2650_v34  ;;  %1659 = vmatpush.bf16.msrb.mxu2 %v2627_v43  ;;  %v2563_v30 = vor.u32 %v2846_v26, %v2562_v25  ;;  %v2570_v33 = vld [vmem:[%s3376_s12 + $0x28] sm:$0xf]  ;;  %v2847_v34 = vld [vmem:[%s3376_s12 + $0x34] sm:$0xf0]  ;;  %v2548_v43 = vld [vmem:[%s3376_s12 + $0x10] sm:$0xf0] }
 0x426   : > { %v2567_v35 = vor.u32 %v2844_v27, %v2564_v31  ;;  %v2892_v25 = vld [vmem:[%s3428_s16 + $0xa0] sm:$0xff]  ;;  %v2877_v27 = vld [vmem:[%s3428_s16 + $0x28] sm:$0xff]  ;;  %v2891_v31 = vld [vmem:[%s3428_s16 + $0x98] sm:$0xff] }
 0x427   : > { %1672 = vmatpush.bf16.msra.mxu3 %v2647_v36  ;;  %1686 = vmatpush.bf16.msrb.mxu0 %v2651_v37  ;;  %v2571_v36 = vor.u32 %v2847_v34, %v2570_v33  ;;  %v2845_v37 = vld [vmem:[%s3376_s12 + $0x2c] sm:$0xf]  ;;  %v2900_v26 = vld [vmem:[%s3428_s16 + $0xe0] sm:$0xff]  ;;  %v2899_v33 = vld [vmem:[%s3428_s16 + $0xd8] sm:$0xff] }
 0x428   : > { %v1163_v39 = vpop.f32.mrf.mxu0  ;;  %v2876_v34 = vld [vmem:[%s3428_s16 + $0x20] sm:$0xff] }
 0x429   : > { %v2652_v39 = vld [vmem:[%s3376_s12 + $0xd8] sm:$0xf0] }
 0x493   : > { %v1289_v44 = vpop.f32.mrf.mxu0 }
 0x494   : > { %v1294_v47 = vpack.c.bf16 %v1289_v44, %v1289_v44  ;;  %v2628_v44 = vld [vmem:[%s3376_s12 + $0xb0] sm:$0xf0] }
 0x496   : > { %v1303_v52 = vunpack.c.l.b16 %v1294_v47  ;;  %v2631_v47 = vor.u32 %v2860_v42, %v2628_v44  ;;  %v2840_v42 = vld [vmem:[%s3376_s12 + $0x4] sm:$0xf] }
 0x498   : > { %1673 = vmatpush.bf16.msra.mxu3 %v2631_v47  ;;  %v2554_v47 = vld [vmem:[%s3376_s12 + $0x8] sm:$0xf] }
 0x49a   : > { %v1265_v48 = vpop.f32.mrf.mxu3 }
 0x49b   : > { %v1293_v49 = vpack.c.bf16 %v1265_v48, %v1265_v48  ;;  %v1291_v50 = vpop.f32.mrf.mxu0  ;;  %v2635_v48 = vor.u32 %v2863_v46, %v2634_v45  ;;  %v2551_v46 = vor.u32 %v2840_v42, %v2548_v43  ;;  %v2874_v42 = vld [vmem:[%s3428_s16 + $0x10] sm:$0xff] }
 0x49c   : > { %v2636_v50 = vld [vmem:[%s3376_s12 + $0xb8] sm:$0xf0]  ;;  %v2882_v43 = vld [vmem:[%s3428_s16 + $0x50] sm:$0xff] }
 0x49d   : > { %v1302_v53 = vunpack.c.l.b16 %v1293_v49  ;;  %v2861_v49 = vld [vmem:[%s3376_s12 + $0xac] sm:$0xf]  ;;  %1687 = vmatpush.bf16.msrb.mxu0 %v2635_v48  ;;  %v2843_v48 = vld [vmem:[%s3376_s12 + $0x14] sm:$0xf0] }
 0x49e   : > { %v2639_v51 = vor.u32 %v2861_v49, %v2636_v50  ;;  %v2841_v49 = vld [vmem:[%s3376_s12 + $0xc] sm:$0xf]  ;;  %v2555_v50 = vor.u32 %v2843_v48, %v2554_v47 }
 0x49f   : > { %v1304_v54 = vpack.c.b16 %v1303_v52, %v1302_v53  ;;  %v2610_v52 = vld [vmem:[%s3376_s12 + $0x80] sm:$0xf]  ;;  %v2858_v53 = vld [vmem:[%s3376_s12 + $0x8c] sm:$0xf0]  ;;  %v2873_v48 = vld [vmem:[%s3428_s16 + $0x8] sm:$0xff] }
 0x4a1   : > { %1305 = vrot.lane.b32.xlu1 %v1304_v54, %s3196_s1  ;;  %v2856_v54 = vld [vmem:[%s3376_s12 + $0x84] sm:$0xf] }
 0x4a2   : > { %v1267_v55 = vpop.f32.mrf.mxu3 }
 0x4a3   : > { %v2611_v55 = vor.u32 %v2858_v53, %v2610_v52 }
 0x4a5   : > { %1660 = vmatpush.bf16.msrb.mxu2 %v2611_v55 }
 0x513   : > { %v1306_v56 = vpop.permute.xlu1 %1305 }
 0x514   : > { %v1309_v57 = vsel %vm1060_vm7, %v1299_v38, %v1306_v56  ;;  %v2865_v38 = vld [vmem:[%s3376_s12 + $0xcc] sm:$0xf]  ;;  %v2612_v56 = vld [vmem:[%s3376_s12 + $0x90] sm:$0xf0] }
 0x515   : > { %1387 = vmatmul.bf16.vlgmr.msrb.gmra.mxu1 %v1309_v57  ;;  %v2655_v32 = vor.u32 %v2865_v38, %v2652_v39  ;;  %v2618_v57 = vld [vmem:[%s3376_s12 + $0x88] sm:$0xf]  ;;  %v2572_v38 = vld [vmem:[%s3376_s12 + $0x38] sm:$0xf0]  ;;  %v2546_v39 = vld [vmem:[%s3376_s12] sm:$0xf] }
 0x516   : > { %v2575_v40 = vor.u32 %v2845_v37, %v2572_v38  ;;  %v2547_v45 = vor.u32 %v2842_v41, %v2546_v39  ;;  %v2898_v37 = vld [vmem:[%s3428_s16 + $0xd0] sm:$0xff]  ;;  %v2875_v38 = vld [vmem:[%s3428_s16 + $0x18] sm:$0xff] }
 0x517   : > { %1700 = vmatpush.bf16.msra.mxu1 %v2655_v32  ;;  %v2883_v39 = vld [vmem:[%s3428_s16 + $0x58] sm:$0xff]  ;;  %v3680_v41 = vld [vmem:[%s3414_s5] sm:$0xf] }
 0x518   : > { %v1492_v47 = vperm.slane %v3680_v41, 3 }
 0x51b   : > { %1701 = vmatpush.bf16.msra.mxu1 %v2639_v51  ;;  %v2556_v51 = vld [vmem:[%s3376_s12 + $0x18] sm:$0xf0] }
 0x51c   : > { %v2559_v53 = vor.u32 %v2841_v49, %v2556_v51  ;;  %v2881_v49 = vld [vmem:[%s3428_s16 + $0x48] sm:$0xff] }
 0x592   : > { %v1388_v59 = vpop.f32.mrf.mxu1 }
 0x593   : > { %v1389_v60 = vadd.f32 %v2995_v58, %v1388_v59  ;;  %v2615_v59 = vor.u32 %v2856_v54, %v2612_v56 }
 0x595   : > { %v1393_v61 = vadd.f32 %v1389_v60, %v3475_v28  ;;  %1674 = vmatpush.bf16.msra.mxu3 %v2615_v59 }
 0x597   : > { %1397 = vadd.xlane.f32.xlu2 %v1393_v61 }
 0x59a   : > { %v1390_v62 = vpop.f32.mrf.mxu1 }
 0x59b   : > { %v1391_v63 = vadd.f32 %v2995_v58, %v1390_v62  ;;  %v2859_v58 = vld [vmem:[%s3376_s12 + $0x94] sm:$0xf0]  ;;  %v2620_v62 = vld [vmem:[%s3376_s12 + $0x98] sm:$0xf0] }
 0x59c   : > { %v2619_v60 = vor.u32 %v2859_v58, %v2618_v57 }
 0x59d   : > { %v1394_v0 = vadd.f32 %v1391_v63, %v3477_v29 }
 0x59e   : > { %1688 = vmatpush.bf16.msrb.mxu0 %v2619_v60 }
 0x59f   : > { %1399 = vadd.xlane.f32.xlu0 %v1394_v0 }
 0x60a   : > { %v1398_v28 = vpop.xlane.xlu2 %1397 }
 0x60b   : > { %v1408_v29 = vmul.f32 %v3559_v7, %v1398_v28  ;;  %v2599_v28 = vor.u32 %v2852_v2, %v2596_v4 }
 0x60d   : > { %v3562_v8 = vsub.f32 %v1393_v61, %v1408_v29  ;;  %v2857_v61 = vld [vmem:[%s3376_s12 + $0x8c] sm:$0xf]  ;;  %v2603_v29 = vor.u32 %v2855_v6, %v2602_v5  ;;  %1675 = vmatpush.bf16.msra.mxu3 %v2599_v28  ;;  %v2996_v6 = vld [vmem:[%s3820_s29] ss:$0 sm:$0xff] }
 0x60e   : > { %v2623_v63 = vor.u32 %v2857_v61, %v2620_v62 }
 0x60f   : > { %v1412_v9 = vmul.f32 %v3562_v8, %v3562_v8  ;;  %1689 = vmatpush.bf16.msrb.mxu0 %v2603_v29 }
 0x610   : > { %1702 = vmatpush.bf16.msra.mxu1 %v2623_v63 }
 0x611   : > { %1414 = vadd.xlane.f32.xlu1 %v1412_v9  ;;  %v2853_v9 = vld [vmem:[%s3376_s12 + $0x6c] sm:$0xf]  ;;  %1676 = vmatpush.bf16.msra.mxu3 %v2583_v20  ;;  %v2887_v20 = vld [vmem:[%s3428_s16 + $0x78] sm:$0xff] }
 0x612   : > { %v1400_v10 = vpop.xlane.xlu0 %1399 }
 0x613   : > { %v1409_v11 = vmul.f32 %v3559_v7, %v1400_v10  ;;  %v2604_v10 = vld [vmem:[%s3376_s12 + $0x78] sm:$0xf0]  ;;  %1690 = vmatpush.bf16.msrb.mxu0 %v2587_v21  ;;  %v2893_v21 = vld [vmem:[%s3428_s16 + $0xa8] sm:$0xff] }
 0x615   : > { %v3567_v12 = vsub.f32 %v1394_v0, %v1409_v11  ;;  %v2594_v0 = vld [vmem:[%s3376_s12 + $0x60] sm:$0xf]  ;;  %v2607_v11 = vor.u32 %v2853_v9, %v2604_v10  ;;  %1677 = vmatpush.bf16.msra.mxu3 %v2567_v35 }
 0x616   : > { %v2595_v3 = vor.u32 %v2854_v1, %v2594_v0  ;;  %v2884_v35 = vld [vmem:[%s3428_s16 + $0x60] sm:$0xff] }
 0x617   : > { %v1413_v13 = vmul.f32 %v3567_v12, %v3567_v12  ;;  %1703 = vmatpush.bf16.msra.mxu1 %v2607_v11  ;;  %1691 = vmatpush.bf16.msrb.mxu0 %v2571_v36  ;;  %v2890_v36 = vld [vmem:[%s3428_s16 + $0x90] sm:$0xff] }
 0x618   : > { %1661 = vmatpush.bf16.msrb.mxu2 %v2595_v3 }
 0x619   : > { %1416 = vadd.xlane.f32.xlu2 %v1413_v13  ;;  %v2578_v13 = vld [vmem:[%s3376_s12 + $0x40] sm:$0xf]  ;;  %1678 = vmatpush.bf16.msra.mxu3 %v2551_v46  ;;  %v1491_v46 = vperm.slane %v3680_v41, 2 }
 0x61a   : > { %v2579_v16 = vor.u32 %v2850_v14, %v2578_v13 }
 0x61b   : > { %1704 = vmatpush.bf16.msra.mxu1 %v2591_v24  ;;  %1692 = vmatpush.bf16.msrb.mxu0 %v2555_v50  ;;  %v2886_v24 = vld [vmem:[%s3428_s16 + $0x70] sm:$0xff] }
 0x61c   : > { %1662 = vmatpush.bf16.msrb.mxu2 %v2579_v16  ;;  %v2903_v16 = vld [vmem:[%s3428_s16 + $0xf8] sm:$0xff] }
 0x61d   : > { %2063 = vmatpush.bf16.msrb.mxu3 %v2887_v20 }
 0x61f   : > { %1705 = vmatpush.bf16.msra.mxu1 %v2575_v40  ;;  %v2897_v40 = vld [vmem:[%s3428_s16 + $0xc8] sm:$0xff] }
 0x620   : > { %1663 = vmatpush.bf16.msrb.mxu2 %v2563_v30  ;;  %v2885_v30 = vld [vmem:[%s3428_s16 + $0x68] sm:$0xff] }
 0x621   : > { %2064 = vmatpush.bf16.msrb.mxu3 %v2886_v24 }
 0x623   : > { %1706 = vmatpush.bf16.msra.mxu1 %v2559_v53 }
 0x624   : > { %1664 = vmatpush.bf16.msrb.mxu2 %v2547_v45  ;;  %v2896_v45 = vld [vmem:[%s3428_s16 + $0xc0] sm:$0xff] }
 0x625   : > { %2065 = vmatpush.bf16.msrb.mxu3 %v2885_v30 }
 0x627   : > { %2091 = vmatpush.bf16.msrb.mxu1 %v2903_v16 }
 0x628   : > { %2049 = vmatpush.bf16.msra.mxu2 %v2879_v19 }
 0x629   : > { %2066 = vmatpush.bf16.msrb.mxu3 %v2884_v35 }
 0x62b   : > { %2092 = vmatpush.bf16.msrb.mxu1 %v2902_v18 }
 0x62c   : > { %2050 = vmatpush.bf16.msra.mxu2 %v2878_v23 }
 0x62d   : > { %2067 = vmatpush.bf16.msrb.mxu3 %v2883_v39 }
 0x62f   : > { %2093 = vmatpush.bf16.msrb.mxu1 %v2901_v22 }
 0x630   : > { %2051 = vmatpush.bf16.msra.mxu2 %v2877_v27 }
 0x631   : > { %2068 = vmatpush.bf16.msrb.mxu3 %v2882_v43 }
 0x633   : > { %2094 = vmatpush.bf16.msrb.mxu1 %v2900_v26 }
 0x634   : > { %2052 = vmatpush.bf16.msra.mxu2 %v2876_v34 }
 0x635   : > { %2069 = vmatpush.bf16.msrb.mxu3 %v2881_v49 }
 0x637   : > { %2095 = vmatpush.bf16.msrb.mxu1 %v2899_v33 }
 0x638   : > { %2053 = vmatpush.bf16.msra.mxu2 %v2875_v38 }
 0x63b   : > { %2096 = vmatpush.bf16.msrb.mxu1 %v2898_v37 }
 0x63c   : > { %2054 = vmatpush.bf16.msra.mxu2 %v2874_v42 }
 0x63f   : > { %2097 = vmatpush.bf16.msrb.mxu1 %v2897_v40 }
 0x640   : > { %2055 = vmatpush.bf16.msra.mxu2 %v2873_v48 }
 0x643   : > { %2098 = vmatpush.bf16.msrb.mxu1 %v2896_v45 }
 0x684   : > { %v1415_v32 = vpop.xlane.xlu1 %1414 }
 0x685   : > { %v1418_v44 = vmul.f32 %v1415_v32, %v3559_v7  ;;  %v2889_v32 = vld [vmem:[%s3428_s16 + $0x88] sm:$0xff] }
 0x687   : > { %v1420_v52 = vadd.f32 1e-12, %v1418_v44  ;;  %v2888_v44 = vld [vmem:[%s3428_s16 + $0x80] sm:$0xff] }
 0x689   : > { %3019 = vrsqrt.f32 %v1420_v52  ;;  %vm1428_vm12 = vweird.f32 %v1420_v52 }
 0x68c   : > { %v1417_v54 = vpop.xlane.xlu2 %1416 }
 0x68d   : > { %v1419_v55 = vmul.f32 %v1417_v54, %v3559_v7  ;;  %v1489_v54 = vperm.slane %v3680_v41, 0 }
 0x68f   : > { %v3020_v56 = vpop.eup %3019  ;;  %v1421_v57 = vadd.f32 1e-12, %v1419_v55  ;;  %v1490_v55 = vperm.slane %v3680_v41, 1 }
 0x690   : > { %v1423_v58 = vmul.f32 %v3020_v56, %v1420_v52  ;;  %vm1429_vm11 = vweird.f32 %v3020_v56 }
 0x691   : > { %3021 = vrsqrt.f32 %v1421_v57  ;;  %vm1430_vm13 = vmor %vm1428_vm12, %vm1429_vm11  ;;  %vm1438_vm15 = vweird.f32 %v1421_v57 }
 0x692   : > { %v1424_v59 = vmul.f32 %v3020_v56, %v1423_v58  ;;  %v2872_v58 = vld [vmem:[%s3428_s16] sm:$0xff] }
 0x693   : > { %2056 = vmatpush.bf16.msra.mxu2 %v2872_v58 }
 0x694   : > { %v1425_v60 = vmul.f32 0.5, %v1424_v59  ;;  %v2880_v59 = vld [vmem:[%s3428_s16 + $0x40] sm:$0xff] }
 0x695   : > { %2070 = vmatpush.bf16.msrb.mxu3 %v2880_v59 }
 0x696   : > { %v1426_v61 = vsub.f32 1.5, %v1425_v60 }
 0x697   : > { %v3022_v62 = vpop.eup %3021 }
 0x698   : > { %v1427_v63 = vmul.f32 %v3020_v56, %v1426_v61  ;;  %v1433_v0 = vmul.f32 %v3022_v62, %v1421_v57  ;;  %vm1439_vm14 = vweird.f32 %v3022_v62 }
 0x699   : > { %vm1440_vm0 = vmor %vm1438_vm15, %vm1439_vm14 }
 0x69a   : > { %v1434_v1 = vmul.f32 %v3022_v62, %v1433_v0  ;;  %v1431_v2 = vsel %vm1430_vm13, %v3020_v56, %v1427_v63 }
 0x69b   : > { %v1442_v5 = vmul.f32 %v1431_v2, %v3562_v8  ;;  %v2997_v8 = vld [vmem:[%s751_s3] ss:$0 sm:$0xff] }
 0x69c   : > { %v1435_v3 = vmul.f32 0.5, %v1434_v1 }
 0x69d   : > { %v1447_v10 = vmul.f32 %v2996_v6, %v1442_v5 }
 0x69e   : > { %v1436_v4 = vsub.f32 1.5, %v1435_v3 }
 0x69f   : > { %v3649_v13 = vadd.f32 %v2997_v8, %v1447_v10 }
 0x6a0   : > { %v1437_v28 = vmul.f32 %v3022_v62, %v1436_v4 }
 0x6a2   : > { %v1441_v29 = vsel %vm1440_vm0, %v3022_v62, %v1437_v28 }
 0x6a3   : > { %v1443_v9 = vmul.f32 %v1441_v29, %v3567_v12  ;;  %v2895_v12 = vld [vmem:[%s3428_s16 + $0xb8] sm:$0xff] }
 0x6a4   : > { %2077 = vmatpush.bf16.msra.mxu0 %v2895_v12 }
 0x6a5   : > { %v1448_v11 = vmul.f32 %v2996_v6, %v1443_v9 }
 0x6a7   : > { %v3651_v14 = vadd.f32 %v2997_v8, %v1448_v11 }
 0x6a8   : > { %2078 = vmatpush.bf16.msra.mxu0 %v2894_v17 }
 0x6a9   : > { %v1454_v15 = vpack.c.bf16 %v3651_v14, %v3649_v13 }
 0x6ab   : > { %1665 = vmatmul.bf16.vlgmr.msrb.gmra.mxu2 %v1454_v15  ;;  %1679 = vmatmul.bf16.vlgmr.msra.gmra.mxu3 %v1454_v15 }
 0x6ac   : > { %1693 = vmatmul.bf16.vlgmr.msrb.gmra.mxu0 %v1454_v15  ;;  %1707 = vmatmul.bf16.vlgmr.msra.gmra.mxu1 %v1454_v15 }
 0x6ad   : > { %2079 = vmatpush.bf16.msra.mxu0 %v2893_v21 }
 0x6b1   : > { %2080 = vmatpush.bf16.msra.mxu0 %v2892_v25 }
 0x6b5   : > { %2081 = vmatpush.bf16.msra.mxu0 %v2891_v31 }
 0x6b9   : > { %2082 = vmatpush.bf16.msra.mxu0 %v2890_v36 }
 0x6bd   : > { %2083 = vmatpush.bf16.msra.mxu0 %v2889_v32 }
 0x6c1   : > { %2084 = vmatpush.bf16.msra.mxu0 %v2888_v44 }
 0x729   : > { %v1694_v50 = vpop.f32.mrf.mxu0  ;;  %v1708_v51 = vpop.f32.mrf.mxu1 }
 0x72a   : > { %v3690_v52 = vadd.f32 %v1694_v50, %v1491_v46  ;;  %v3692_v53 = vadd.f32 %v1708_v51, %v1492_v47 }
 0x72c   : > { %v1723_v56 = vmul.f32 0.044715, %v3690_v52  ;;  %v1724_v57 = vmul.f32 0.044715, %v3692_v53  ;;  %v1715_v58 = vmul.f32 0.5, %v3690_v52 }
 0x72e   : > { %v1731_v60 = vmul.f32 %v1723_v56, %v3690_v52  ;;  %v1732_v61 = vmul.f32 %v1724_v57, %v3692_v53  ;;  %v1666_v62 = vpop.f32.mrf.mxu2  ;;  %v1680_v63 = vpop.f32.mrf.mxu3 }
 0x72f   : > { %v3702_v0 = vadd.f32 %v1666_v62, %v1489_v54  ;;  %v3704_v1 = vadd.f32 %v1680_v63, %v1490_v55  ;;  %v1716_v62 = vmul.f32 0.5, %v3692_v53 }
 0x730   : > { %v1739_v2 = vmul.f32 %v1731_v60, %v3690_v52  ;;  %v1740_v3 = vmul.f32 %v1732_v61, %v3692_v53 }
 0x731   : > { %v1721_v4 = vmul.f32 0.044715, %v3702_v0  ;;  %v1722_v5 = vmul.f32 0.044715, %v3704_v1  ;;  %v1696_v6 = vpop.f32.mrf.mxu0  ;;  %v1710_v28 = vpop.f32.mrf.mxu1 }
 0x732   : > { %v1747_v29 = vadd.f32 %v1739_v2, %v3690_v52  ;;  %v1697_v9 = vadd.f32 %v1696_v6, %v1491_v46  ;;  %v1711_v10 = vadd.f32 %v1710_v28, %v1492_v47  ;;  %v1748_v8 = vadd.f32 %v1740_v3, %v3692_v53 }
 0x733   : > { %v1729_v11 = vmul.f32 %v1721_v4, %v3702_v0  ;;  %v1730_v15 = vmul.f32 %v1722_v5, %v3704_v1  ;;  %v1714_v53 = vmul.f32 0.5, %v3704_v1 }
 0x734   : > { %v1727_v12 = vmul.f32 0.044715, %v1697_v9  ;;  %v1728_v18 = vmul.f32 0.044715, %v1711_v10  ;;  %v1755_v19 = vmul.f32 0.7978846, %v1747_v29 }
 0x735   : > { %v1737_v16 = vmul.f32 %v1729_v11, %v3702_v0  ;;  %v1738_v17 = vmul.f32 %v1730_v15, %v3704_v1  ;;  %v1756_v23 = vmul.f32 0.7978846, %v1748_v8  ;;  %v1719_v59 = vmul.f32 0.5, %v1697_v9 }
 0x736   : > { %v1735_v20 = vmul.f32 %v1727_v12, %v1697_v9  ;;  %v1668_v21 = vpop.f32.mrf.mxu2  ;;  %v1682_v22 = vpop.f32.mrf.mxu3  ;;  %v1736_v25 = vmul.f32 %v1728_v18, %v1711_v10  ;;  %3023 = vtanh.f32 %v1755_v19  ;;  %v1720_v63 = vmul.f32 0.5, %v1711_v10 }
 0x737   : > { %v1745_v24 = vadd.f32 %v1737_v16, %v3702_v0  ;;  %v1669_v26 = vadd.f32 %v1668_v21, %v1489_v54  ;;  %v1746_v27 = vadd.f32 %v1738_v17, %v3704_v1  ;;  %v1683_v31 = vadd.f32 %v1682_v22, %v1490_v55 }
 0x738   : > { %v1743_v30 = vmul.f32 %v1735_v20, %v1697_v9  ;;  %v1744_v34 = vmul.f32 %v1736_v25, %v1711_v10  ;;  %3025 = vtanh.f32 %v1756_v23  ;;  %v1713_v16 = vmul.f32 0.5, %v3702_v0  ;;  %v2998_v0 = vld [vmem:[%s758_s24] ss:$0 sm:$0xff] }
 0x739   : > { %v1753_v33 = vmul.f32 0.7978846, %v1745_v24  ;;  %v1725_v35 = vmul.f32 0.044715, %v1669_v26  ;;  %v1726_v37 = vmul.f32 0.044715, %v1683_v31 }
 0x73a   : > { %v1751_v36 = vadd.f32 %v1743_v30, %v1697_v9  ;;  %v1752_v38 = vadd.f32 %v1744_v34, %v1711_v10  ;;  %v1754_v32 = vmul.f32 0.7978846, %v1746_v27  ;;  %v1717_v52 = vmul.f32 0.5, %v1669_v26 }
 0x73b   : > { %v1733_v39 = vmul.f32 %v1725_v35, %v1669_v26  ;;  %v1734_v41 = vmul.f32 %v1726_v37, %v1683_v31  ;;  %3027 = vtanh.f32 %v1753_v33  ;;  %v1718_v10 = vmul.f32 0.5, %v1683_v31 }
 0x73c   : > { %v1759_v40 = vmul.f32 0.7978846, %v1751_v36  ;;  %v1760_v42 = vmul.f32 0.7978846, %v1752_v38  ;;  %v3024_v46 = vpop.eup %3023 }
 0x73d   : > { %v1741_v43 = vmul.f32 %v1733_v39, %v1669_v26  ;;  %v1742_v44 = vmul.f32 %v1734_v41, %v1683_v31  ;;  %v1771_v54 = vadd.f32 1.0, %v3024_v46 }
 0x73e   : > { %3029 = vtanh.f32 %v1759_v40  ;;  %v3026_v48 = vpop.eup %3025 }
 0x73f   : > { %v1749_v45 = vadd.f32 %v1741_v43, %v1669_v26  ;;  %3031 = vtanh.f32 %v1760_v42  ;;  %v1750_v47 = vadd.f32 %v1742_v44, %v1683_v31  ;;  %v1772_v56 = vadd.f32 1.0, %v3026_v48 }
 0x740   : > { %3033 = vtanh.f32 %v1754_v32  ;;  %v1779_v3 = vmul.f32 %v1771_v54, %v1715_v58 }
 0x741   : > { %v1757_v49 = vmul.f32 0.7978846, %v1749_v45  ;;  %v1758_v50 = vmul.f32 0.7978846, %v1750_v47  ;;  %v3028_v51 = vpop.eup %3027  ;;  %v1780_v5 = vmul.f32 %v1772_v56, %v1716_v62 }
 0x742   : > { %v1769_v28 = vadd.f32 1.0, %v3028_v51 }
 0x743   : > { %3035 = vtanh.f32 %v1757_v49 }
 0x744   : > { %v3030_v55 = vpop.eup %3029  ;;  %3037 = vtanh.f32 %v1758_v50  ;;  %v1777_v18 = vmul.f32 %v1769_v28, %v1713_v16 }
 0x745   : > { %v3032_v57 = vpop.eup %3031  ;;  %v1775_v60 = vadd.f32 1.0, %v3030_v55 }
 0x746   : > { %v3034_v61 = vpop.eup %3033  ;;  %v1776_v2 = vadd.f32 1.0, %v3032_v57 }
 0x747   : > { %v1783_v4 = vmul.f32 %v1775_v60, %v1719_v59  ;;  %v1770_v11 = vadd.f32 1.0, %v3034_v61 }
 0x748   : > { %v1784_v6 = vmul.f32 %v1776_v2, %v1720_v63 }
 0x749   : > { %v3036_v29 = vpop.eup %3035  ;;  %v1787_v8 = vpack.c.bf16 %v1783_v4, %v1779_v3  ;;  %v1778_v20 = vmul.f32 %v1770_v11, %v1714_v53  ;;  %v2999_v3 = vld [vmem:[%s761_s22] ss:$0 sm:$0xff] }
 0x74a   : > { %v3038_v15 = vpop.eup %3037  ;;  %v1788_v12 = vpack.c.bf16 %v1784_v6, %v1780_v5  ;;  %v1773_v9 = vadd.f32 1.0, %v3036_v29  ;;  %v3000_v5 = vld [vmem:[%s764_s19] ss:$0 sm:$0xff] }
 0x74b   : > { %2085 = vmatmul.bf16.vlgmr.msra.gmra.mxu0 %v1787_v8  ;;  %v1774_v17 = vadd.f32 1.0, %v3038_v15 }
 0x74c   : > { %2099 = vmatmul.bf16.vlgmr.msrb.gmra.mxu1 %v1788_v12  ;;  %v1781_v19 = vmul.f32 %v1773_v9, %v1717_v52 }
 0x74d   : > { %v1782_v21 = vmul.f32 %v1774_v17, %v1718_v10 }
 0x74e   : > { %v1785_v22 = vpack.c.bf16 %v1781_v19, %v1777_v18 }
 0x74f   : > { %v1786_v23 = vpack.c.bf16 %v1782_v21, %v1778_v20 }
 0x750   : > { %2057 = vmatmul.bf16.vlgmr.msra.gmra.mxu2 %v1785_v22 }
 0x751   : > { %2071 = vmatmul.bf16.vlgmr.msrb.gmra.mxu3 %v1786_v23 }
 0x7c8   : > { %v2086_v1 = vpop.f32.mrf.mxu0 }
 0x7c9   : > { %v2100_v30 = vpop.f32.mrf.mxu1 }
 0x7d0   : > { %v2088_v39 = vpop.f32.mrf.mxu0 }
 0x7d1   : > { %v2102_v40 = vpop.f32.mrf.mxu1 }
 0x7d3   : > { %v2058_v24 = vpop.f32.mrf.mxu2 }
 0x7d4   : > { %v2059_v25 = vadd.f32 %v2998_v0, %v2058_v24  ;;  %v2072_v26 = vpop.f32.mrf.mxu3 }
 0x7d6   : > { %v2073_v27 = vadd.f32 %v2072_v26, %v2059_v25 }
 0x7d8   : > { %v2087_v31 = vadd.f32 %v2086_v1, %v2073_v27 }
 0x7da   : > { %v2101_v33 = vadd.f32 %v2100_v30, %v2087_v31 }
 0x7db   : > { %v2060_v34 = vpop.f32.mrf.mxu2 }
 0x7dc   : > { %v2061_v35 = vadd.f32 %v2998_v0, %v2060_v34  ;;  %v2105_v36 = vadd.f32 %v2101_v33, %v3649_v13  ;;  %v2074_v37 = vpop.f32.mrf.mxu3 }
 0x7de   : > { %v2075_v38 = vadd.f32 %v2074_v37, %v2061_v35  ;;  %2109 = vadd.xlane.f32.xlu0 %v2105_v36 }
 0x7e0   : > { %v2089_v32 = vadd.f32 %v2088_v39, %v2075_v38 }
 0x7e2   : > { %v2103_v41 = vadd.f32 %v2102_v40, %v2089_v32 }
 0x7e4   : > { %v2106_v42 = vadd.f32 %v2103_v41, %v3651_v14 }
 0x7e6   : > { %2111 = vadd.xlane.f32.xlu2 %v2106_v42 }
 0x851   : > { %v2110_v43 = vpop.xlane.xlu0 %2109 }
 0x852   : > { %v2113_v44 = vmul.f32 %v2110_v43, %v3559_v7 }
 0x854   : > { %v2115_v45 = vsub.f32 %v2105_v36, %v2113_v44 }
 0x856   : > { %v2117_v46 = vmul.f32 %v2115_v45, %v2115_v45 }
 0x858   : > { %2119 = vadd.xlane.f32.xlu1 %v2117_v46 }
 0x859   : > { %v2112_v47 = vpop.xlane.xlu2 %2111 }
 0x85a   : > { %v2114_v48 = vmul.f32 %v2112_v47, %v3559_v7 }
 0x85c   : > { %v2116_v13 = vsub.f32 %v2106_v42, %v2114_v48 }
 0x85e   : > { %v2118_v49 = vmul.f32 %v2116_v13, %v2116_v13 }
 0x860   : > { %2121 = vadd.xlane.f32.xlu0 %v2118_v49 }
 0x8cb   : > { %v2120_v50 = vpop.xlane.xlu1 %2119 }
 0x8cc   : > { %v2123_v51 = vmul.f32 %v2120_v50, %v3559_v7 }
 0x8ce   : > { %v2125_v54 = vadd.f32 1e-12, %v2123_v51 }
 0x8d0   : > { %3039 = vrsqrt.f32 %v2125_v54  ;;  %vm2133_vm2 = vweird.f32 %v2125_v54 }
 0x8d3   : > { %v2122_v14 = vpop.xlane.xlu0 %2121 }
 0x8d4   : > { %v2124_v55 = vmul.f32 %v2122_v14, %v3559_v7 }
 0x8d6   : > { %v3040_v56 = vpop.eup %3039  ;;  %v2126_v57 = vadd.f32 1e-12, %v2124_v55 }
 0x8d7   : > { %v2128_v58 = vmul.f32 %v3040_v56, %v2125_v54  ;;  %vm2134_vm1 = vweird.f32 %v3040_v56 }
 0x8d8   : > { %3041 = vrsqrt.f32 %v2126_v57  ;;  %vm2135_vm3 = vmor %vm2133_vm2, %vm2134_vm1  ;;  %vm2143_vm5 = vweird.f32 %v2126_v57 }
 0x8d9   : > { %v2129_v59 = vmul.f32 %v3040_v56, %v2128_v58 }
 0x8db   : > { %v2130_v60 = vmul.f32 0.5, %v2129_v59 }
 0x8dd   : > { %v2131_v61 = vsub.f32 1.5, %v2130_v60 }
 0x8de   : > { %v3042_v62 = vpop.eup %3041 }
 0x8df   : > { %v2132_v63 = vmul.f32 %v3040_v56, %v2131_v61  ;;  %v2138_v2 = vmul.f32 %v3042_v62, %v2126_v57  ;;  %vm2144_vm4 = vweird.f32 %v3042_v62 }
 0x8e0   : > { %vm2145_vm6 = vmor %vm2143_vm5, %vm2144_vm4 }
 0x8e1   : > { %v2136_v7 = vsel %vm2135_vm3, %v3040_v56, %v2132_v63  ;;  %v2139_v4 = vmul.f32 %v3042_v62, %v2138_v2 }
 0x8e2   : > { %v2147_v6 = vmul.f32 %v2136_v7, %v2115_v45 }
 0x8e3   : > { %v2140_v28 = vmul.f32 0.5, %v2139_v4 }
 0x8e4   : > { %v2152_v29 = vmul.f32 %v2999_v3, %v2147_v6 }
 0x8e5   : > { %v2141_v8 = vsub.f32 1.5, %v2140_v28 }
 0x8e6   : > { %v2157_v11 = vadd.f32 %v3000_v5, %v2152_v29 }
 0x8e7   : > { %v2142_v15 = vmul.f32 %v3042_v62, %v2141_v8 }
 0x8e8   : > { %2159 = vst [vmem:[#allocation2] sm:$0xff] %v2157_v11 }
 0x8e9   : > { %v2146_v12 = vsel %vm2145_vm6, %v3042_v62, %v2142_v15 }
 0x8ea   : > { %v2148_v16 = vmul.f32 %v2146_v12, %v2116_v13 }
 0x8ec   : > { %v2153_v52 = vmul.f32 %v2999_v3, %v2148_v16  ;;  %2164 = sbr.rel (%p2800_p1) target bundleno = 2292 (0x8f4), region = 100 }
 0x8ee   : > { %v2158_v9 = vadd.f32 %v3000_v5, %v2153_v52 }
 0x8f0   : > { %2160 = vst [vmem:[#allocation2 + $0x8] sm:$0xff] %v2158_v9 }
 0x8f1   : > { %v2907_v53 = vpack.c.bf16 %v2158_v9, %v2157_v11 }
 0x8f3   : > { %2908 = vst [vmem:[%s3824_s20] sm:$0xff] %v2907_v53  }
 0x8f4 PF: > { %s31_s23 = sadd.s32 1, %s3187_s23   ;;  %s3825_s18 = sld [smem:[#allocation10_spill]] }
 0x8f5   : > { %p28_p2 = scmp.ge.s32.totalorder %s31_s23, 6   ;;  %s3826_s19 = sld [smem:[#allocation11_spill]] }
 0x8f6   : > { %s3827_s20 = sld [smem:[#allocation14_spill]] }
 0x8f7   : > { %s3828_s21 = sld [smem:[#allocation12_spill]]  ;;  %30 = sbr.rel (!%p28_p2) target bundleno = 19 (0x13), region = 182 }
 0x8f8   : > { %s3829_s22 = sld [smem:[#allocation13_spill]] }
 0x8fc   :  { %2191 = vsyncpa [#allocation4], 1 }
 0x8fd   :  { %2193 = vsyncpa [#allocation4 + $0x1], 1 }
 0x8fe   :  { %2194 = vsyncpa [#allocation6], 1 }
 0x8ff   :  { %2196 = vsyncpa [#allocation6 + $0x1], 1 }

</bundles_post_ra>
